<compile_context>
chip_gen: v5e
topology: v5e:2x2
jax: 0.10.0
libtpu: 0.0.40
codegen_flags: <defaults>
</compile_context>

<pallas_src>
import jax
import jax.numpy as jnp
from jax.experimental import pallas as pl
from jax.experimental.pallas import tpu as pltpu

EPS = 1e-6
NUM_SCALES = 4  # k=4 in MaskedMSGradLoss.forward


# ------------------------------ kernel helpers (traced inside the kernel) ----

def _sobel_abs_sum(res):
    """sum |Sobel_x(res)| + |Sobel_y(res)| over the VALID 3x3 window.

    Separable form: Kx = [1,2,1]^T x [-1,0,1], Ky = [-1,0,1]^T x [1,2,1]
    (abs makes the sign convention irrelevant). One reduction per call.
    """
    H, W = res.shape
    h, w = H - 2, W - 2
    v1 = res[0:h, :] + 2.0 * res[1:1 + h, :] + res[2:2 + h, :]   # vertical [1,2,1]
    v2 = res[2:2 + h, :] - res[0:h, :]                           # vertical [-1,0,1]
    gx = v1[:, 2:2 + w] - v1[:, 0:w]
    gy = v2[:, 0:w] + 2.0 * v2[:, 1:1 + w] + v2[:, 2:2 + w]
    return jnp.sum(jnp.abs(gx) + jnp.abs(gy))


# ------------------------------------ the Pallas kernel ----------------------

def g2_loss_kernel(pred_ref, gt_ref, mask_ref, o_ref,
                   res0_ref, res1_ref, res2_ref):
    BT, H, W = pred_ref.shape
    scr = (res0_ref, res1_ref, res2_ref)   # residual pyramid scratch (scales 0..2)

    # ---- hoisted per-grid-step constants (not CSE'd if rebuilt per image) ----
    out_row = jax.lax.broadcasted_iota(jnp.int32, (8, 128), 0)
    # 0/1 even-column selection matrices (one per decimation step); the matmul
    # lands on the otherwise-idle MXU instead of the VALU.
    sels = []
    for i in range(NUM_SCALES - 1):
        w = W >> i
        src = jax.lax.broadcasted_iota(jnp.int32, (w, w // 2), 0)
        dst = jax.lax.broadcasted_iota(jnp.int32, (w, w // 2), 1)
        sels.append((src == 2 * dst).astype(jnp.float32))

    def per_image(j, carry):
        p = pred_ref[j]                     # (H, W)
        g = gt_ref[j]
        m = mask_ref[j]

        msum = jnp.sum(m)
        inv_m = 1.0 / jnp.where(msum == 0.0, EPS, msum)   # hoisted, reused 4x

        mean_p = jnp.sum(p * m) * inv_m
        mean_g = jnp.sum(g * m) * inv_m
        std_p = jnp.sum(jnp.abs((p - mean_p) * m)) * inv_m + EPS
        std_g = jnp.sum(jnp.abs((g - mean_g) * m)) * inv_m + EPS

        # absolute (data) loss numerator
        abs_num = jnp.sum(jnp.abs((p - g) * m))

        # standardized relative residual: scalar reciprocals, no tile divides
        res = ((p - mean_p) * (1.0 / std_p) - (g - mean_g) * (1.0 / std_g)) * m
        ai_num = jnp.sum(jnp.abs(res))

        # ---- multi-scale Sobel on a hierarchically decimated residual ----
        msg_num = _sobel_abs_sum(res)       # scale 0, full resolution
        cur = res
        for i in range(1, NUM_SCALES):
            src_ref = scr[i - 1]            # (H>>(i-1), W>>(i-1))
            src_ref[...] = cur
            # rows: stride-2 sublane read (even rows) from VMEM scratch
            rows = src_ref[pl.ds(0, H >> i, stride=2), :]          # (H>>i, W>>(i-1))
            # cols: even-lane selection matmul on the MXU
            cur = jnp.dot(rows, sels[i - 1],
                          preferred_element_type=jnp.float32)      # (H>>i, W>>i)
            msg_num = msg_num + _sobel_abs_sum(cur)

        # emit the 4 per-image partial sums as a lane-dense (8,128) tile:
        # row 0 -> sum(mask), row 1 -> abs numerator, row 2 -> ai numerator,
        # row 3 -> msg numerator, remaining rows zero.
        tile = (jnp.where(out_row == 0, msum, 0.0)
                + jnp.where(out_row == 1, abs_num, 0.0)
                + jnp.where(out_row == 2, ai_num, 0.0)
                + jnp.where(out_row == 3, msg_num, 0.0))
        o_ref[j] = tile
        return carry

    # fori_loop (not a Python unroll) keeps only one image's intermediates live
    # at a time -> bounded vreg/VMEM pressure even when BT > 1.
    jax.lax.fori_loop(0, BT, per_image, 0)


# ------------------------------------ wrapper ---------------------------------

def _pick_batch_tile(B, H, W, max_tile=8, input_budget_bytes=1 << 20):
    """Images per grid step: amortize per-step overhead for tiny images, keep the
    (double-buffered) per-step input footprint ~1 MiB, and keep the grid at
    >= min(B, 4) steps so megacore (v7x) and the pipeline always have work."""
    per_image = 3 * H * W * 4
    bt = max(1, min(B, max_tile, max(1, input_budget_bytes // per_image)))
    target_steps = min(B, 4)
    bt = max(1, min(bt, B // target_steps))
    while B % bt:
        bt -= 1
    return bt


def _vmem_limit_bytes(bt, H, W):
    """Size the scoped VMEM limit from the actual footprint, clamped to 75% of
    the chip's physical VMEM (64 MiB on v7x, 128 MiB on v5e/v6e)."""
    plane = H * W * 4
    inputs = 2 * 3 * bt * plane                       # double-buffered input blocks
    outputs = 2 * bt * 8 * 128 * 4
    scratch = plane + plane // 4 + plane // 16        # residual pyramid scratch
    interm = 8 * plane                                # per-image live working set
    need = inputs + outputs + scratch + interm
    try:
        cap = pltpu.get_tpu_info().vmem_capacity_bytes
    except Exception:
        cap = 64 << 20
    return int(min(max(2 * need, 16 << 20), (cap * 3) // 4))


def g2_loss(pred, gt, mask_raw, mask_gt):
    """Pallas implementation of G2Loss.forward. Inputs are NCHW with C == 1."""
    del mask_raw  # dead in the reference module (see NOTE above)
    B, C, H, W = pred.shape
    assert C == 1, "G2Loss operates on single-channel depth maps"
    assert H % 8 == 0 and W % 8 == 0 and H // 8 >= 3 and W // 8 >= 3, \
        "need >=3x3 spatial extent at the coarsest of the 4 scales"

    p = pred.reshape(B, H, W).astype(jnp.float32)
    g = gt.reshape(B, H, W).astype(jnp.float32)
    m = mask_gt.reshape(B, H, W).astype(jnp.float32)

    bt = _pick_batch_tile(B, H, W)
    img_spec = pl.BlockSpec((bt, H, W), lambda b: (b, 0, 0))

    partials = pl.pallas_call(
        g2_loss_kernel,
        out_shape=jax.ShapeDtypeStruct((B, 8, 128), jnp.float32),
        grid=(B // bt,),
        in_specs=[img_spec, img_spec, img_spec],
        out_specs=pl.BlockSpec((bt, 8, 128), lambda b: (b, 0, 0)),
        scratch_shapes=[pltpu.VMEM((H >> i, W >> i), jnp.float32)
                        for i in range(NUM_SCALES - 1)],
        compiler_params=pltpu.CompilerParams(
            dimension_semantics=("parallel",),
            vmem_limit_bytes=_vmem_limit_bytes(bt, H, W)),
    )(p, g, m)

    # final cheap reduction / divides in plain JAX
    sums = jnp.sum(partials[:, :4, 0], axis=0)   # (nvalid, abs, ai, msg)
    number_valid = sums[0] + EPS
    return (sums[1] + sums[2] + 0.5 * sums[3]) / number_valid


# --------------------------- pure-JAX reference (for validation) ---------------

def ref_g2_loss(pred, gt, mask_raw, mask_gt):
    eps = 1e-6
    depth = jnp.concatenate([pred, gt], axis=1)
    mask = jnp.concatenate([mask_gt, mask_gt], axis=1)

    mask_num = jnp.sum(mask, axis=(2, 3), keepdims=True)
    mask_num = jnp.where(mask_num == 0, eps, mask_num)
    mean = jnp.sum(depth * mask, axis=(2, 3), keepdims=True) / mask_num
    std = jnp.sum(jnp.abs((depth - mean) * mask), axis=(2, 3), keepdims=True) / mask_num + eps
    sta = (depth - mean) / std
    sta_pred, sta_gt = sta[:, 0:1], sta[:, 1:2]

    nv = jnp.sum(mask_gt) + eps
    loss_abs = jnp.sum(jnp.abs((pred - gt) * mask_gt)) / nv

    res = (sta_pred - sta_gt) * mask_gt
    loss_ai = jnp.sum(jnp.abs(res)) / nv

    kx = jnp.array([[-1., 0., 1.], [-2., 0., 2.], [-1., 0., 1.]], jnp.float32)
    ky = jnp.array([[-1., -2., -1.], [0., 0., 0.], [1., 2., 1.]], jnp.float32)

    def grad_sum(x):
        dn = ('NCHW', 'OIHW', 'NCHW')
        gx = jax.lax.conv_general_dilated(x, kx[None, None], (1, 1), 'VALID',
                                          dimension_numbers=dn)
        gy = jax.lax.conv_general_dilated(x, ky[None, None], (1, 1), 'VALID',
                                          dimension_numbers=dn)
        return jnp.sum(jnp.abs(gx)) + jnp.sum(jnp.abs(gy))

    loss_msg = 0.0
    x = res
    for i in range(NUM_SCALES):
        if i > 0:
            x = x[:, :, ::2, ::2]  # nearest, scale_factor=1/2
        loss_msg = loss_msg + grad_sum(x)
    loss_msg = loss_msg / nv

    return loss_abs + loss_ai + 0.5 * loss_msg


# ------------------------------------ main ------------------------------------

if __name__ == "__main__":
    key = jax.random.PRNGKey(0)
    k1, k2, k3, k4 = jax.random.split(key, 4)

    B, C, H, W = 2, 1, 32, 32  # spatial=32 so all 4 scales (32,16,8,4) fit the 3x3 conv
    pred = jax.random.normal(k1, (B, C, H, W), jnp.float32) + 2.0
    gt = jax.random.normal(k2, (B, C, H, W), jnp.float32) + 2.0
    mask_gt = (jax.random.uniform(k3, (B, C, H, W)) > 0.3).astype(jnp.float32)
    mask_raw = (jax.random.uniform(k4, (B, C, H, W)) > 0.3).astype(jnp.float32)

    loss = jax.block_until_ready(g2_loss(pred, gt, mask_raw, mask_gt))

    ref = jax.block_until_ready(ref_g2_loss(pred, gt, mask_raw, mask_gt))
    assert jnp.allclose(loss, ref, rtol=1e-3, atol=1e-3), (float(loss), float(ref))

    print("KERNEL_OK")
</pallas_src>

<mosaic_0001>
module attributes {stable_mosaic.version = 11 : i64} {
  func.func @g2_loss_kernel(%arg0: i32, %arg1: memref<1x32x32xf32, #tpu.memory_space<vmem>>, %arg2: memref<1x32x32xf32, #tpu.memory_space<vmem>>, %arg3: memref<1x32x32xf32, #tpu.memory_space<vmem>>, %arg4: memref<1x8x128xf32, #tpu.memory_space<vmem>>, %arg5: memref<32x32xf32, #tpu.memory_space<vmem>>, %arg6: memref<16x16xf32, #tpu.memory_space<vmem>>, %arg7: memref<8x8xf32, #tpu.memory_space<vmem>>) attributes {dimension_semantics = [#tpu.dimension_semantics<parallel>], iteration_bounds = array<i64: 2>, scalar_prefetch = 0 : i64, scratch_operands = 3 : i64, tpu.core_type = #tpu.core_type<tc>, window_params = [{transform_indices = @transform_0, window_bounds = array<i64: 1, 32, 32>}, {transform_indices = @transform_1, window_bounds = array<i64: 1, 32, 32>}, {transform_indices = @transform_2, window_bounds = array<i64: 1, 32, 32>}, {transform_indices = @transform_3, window_bounds = array<i64: 1, 8, 128>}]} {
    %0 = tpu.iota {dimensions = array<i32: 0>} : vector<8x128xi32>
    %1 = tpu.iota {dimensions = array<i32: 0>} : vector<32x16xi32>
    %2 = tpu.iota {dimensions = array<i32: 1>} : vector<32x16xi32>
    %c2_i32 = arith.constant 2 : i32
    %3 = vector.broadcast %c2_i32 : i32 to vector<32x16xi32>
    %4 = arith.muli %3, %2 : vector<32x16xi32>
    %5 = arith.cmpi eq, %1, %4 : vector<32x16xi32>
    %6 = arith.extui %5 : vector<32x16xi1> to vector<32x16xi32>
    %7 = arith.sitofp %6 : vector<32x16xi32> to vector<32x16xf32>
    %8 = tpu.iota {dimensions = array<i32: 0>} : vector<16x8xi32>
    %9 = tpu.iota {dimensions = array<i32: 1>} : vector<16x8xi32>
    %c2_i32_0 = arith.constant 2 : i32
    %10 = vector.broadcast %c2_i32_0 : i32 to vector<16x8xi32>
    %11 = arith.muli %10, %9 : vector<16x8xi32>
    %12 = arith.cmpi eq, %8, %11 : vector<16x8xi32>
    %13 = arith.extui %12 : vector<16x8xi1> to vector<16x8xi32>
    %14 = arith.sitofp %13 : vector<16x8xi32> to vector<16x8xf32>
    %15 = tpu.iota {dimensions = array<i32: 0>} : vector<8x4xi32>
    %16 = tpu.iota {dimensions = array<i32: 1>} : vector<8x4xi32>
    %c2_i32_1 = arith.constant 2 : i32
    %17 = vector.broadcast %c2_i32_1 : i32 to vector<8x4xi32>
    %18 = arith.muli %17, %16 : vector<8x4xi32>
    %19 = arith.cmpi eq, %15, %18 : vector<8x4xi32>
    %20 = arith.extui %19 : vector<8x4xi1> to vector<8x4xi32>
    %21 = arith.sitofp %20 : vector<8x4xi32> to vector<8x4xf32>
    %c0_i32 = arith.constant 0 : i32
    %22 = arith.index_cast %c0_i32 : i32 to index
    %c0 = arith.constant 0 : index
    %c0_2 = arith.constant 0 : index
    %23 = vector.load %arg1[%22, %c0, %c0_2] : memref<1x32x32xf32, #tpu.memory_space<vmem>>, vector<1x32x32xf32>
    %24 = vector.shape_cast %23 : vector<1x32x32xf32> to vector<32x32xf32>
    %25 = arith.index_cast %c0_i32 : i32 to index
    %c0_3 = arith.constant 0 : index
    %c0_4 = arith.constant 0 : index
    %26 = vector.load %arg2[%25, %c0_3, %c0_4] : memref<1x32x32xf32, #tpu.memory_space<vmem>>, vector<1x32x32xf32>
    %27 = vector.shape_cast %26 : vector<1x32x32xf32> to vector<32x32xf32>
    %28 = arith.index_cast %c0_i32 : i32 to index
    %c0_5 = arith.constant 0 : index
    %c0_6 = arith.constant 0 : index
    %29 = vector.load %arg3[%28, %c0_5, %c0_6] : memref<1x32x32xf32, #tpu.memory_space<vmem>>, vector<1x32x32xf32>
    %30 = vector.shape_cast %29 : vector<1x32x32xf32> to vector<32x32xf32>
    %31 = vector.shape_cast %30 : vector<32x32xf32> to vector<1x32x32xf32>
    %cst = arith.constant dense<0.000000e+00> : vector<1xf32>
    %32 = vector.multi_reduction <add>, %31, %cst [1, 2] : vector<1x32x32xf32> to vector<1xf32>
    %33 = vector.shape_cast %32 : vector<1xf32> to vector<1x1x1xf32>
    %34 = vector.extract %33[0, 0, 0] : f32 from vector<1x1x1xf32>
    %cst_7 = arith.constant 0.000000e+00 : f32
    %35 = arith.cmpf oeq, %34, %cst_7 : f32
    %cst_8 = arith.constant 9.99999997E-7 : f32
    %36 = arith.select %35, %cst_8, %34 : f32
    %cst_9 = arith.constant 1.000000e+00 : f32
    %37 = arith.divf %cst_9, %36 : f32
    %38 = arith.mulf %24, %30 : vector<32x32xf32>
    %39 = vector.shape_cast %38 : vector<32x32xf32> to vector<1x32x32xf32>
    %cst_10 = arith.constant dense<0.000000e+00> : vector<1xf32>
    %40 = vector.multi_reduction <add>, %39, %cst_10 [1, 2] : vector<1x32x32xf32> to vector<1xf32>
    %41 = vector.shape_cast %40 : vector<1xf32> to vector<1x1x1xf32>
    %42 = vector.extract %41[0, 0, 0] : f32 from vector<1x1x1xf32>
    %43 = arith.mulf %42, %37 : f32
    %44 = arith.mulf %27, %30 : vector<32x32xf32>
    %45 = vector.shape_cast %44 : vector<32x32xf32> to vector<1x32x32xf32>
    %cst_11 = arith.constant dense<0.000000e+00> : vector<1xf32>
    %46 = vector.multi_reduction <add>, %45, %cst_11 [1, 2] : vector<1x32x32xf32> to vector<1xf32>
    %47 = vector.shape_cast %46 : vector<1xf32> to vector<1x1x1xf32>
    %48 = vector.extract %47[0, 0, 0] : f32 from vector<1x1x1xf32>
    %49 = arith.mulf %48, %37 : f32
    %50 = vector.broadcast %43 : f32 to vector<32x32xf32>
    %51 = arith.subf %24, %50 : vector<32x32xf32>
    %52 = arith.mulf %51, %30 : vector<32x32xf32>
    %53 = math.absf %52 : vector<32x32xf32>
    %54 = vector.shape_cast %53 : vector<32x32xf32> to vector<1x32x32xf32>
    %cst_12 = arith.constant dense<0.000000e+00> : vector<1xf32>
    %55 = vector.multi_reduction <add>, %54, %cst_12 [1, 2] : vector<1x32x32xf32> to vector<1xf32>
    %56 = vector.shape_cast %55 : vector<1xf32> to vector<1x1x1xf32>
    %57 = vector.extract %56[0, 0, 0] : f32 from vector<1x1x1xf32>
    %58 = arith.mulf %57, %37 : f32
    %cst_13 = arith.constant 9.99999997E-7 : f32
    %59 = arith.addf %58, %cst_13 : f32
    %60 = vector.broadcast %49 : f32 to vector<32x32xf32>
    %61 = arith.subf %27, %60 : vector<32x32xf32>
    %62 = arith.mulf %61, %30 : vector<32x32xf32>
    %63 = math.absf %62 : vector<32x32xf32>
    %64 = vector.shape_cast %63 : vector<32x32xf32> to vector<1x32x32xf32>
    %cst_14 = arith.constant dense<0.000000e+00> : vector<1xf32>
    %65 = vector.multi_reduction <add>, %64, %cst_14 [1, 2] : vector<1x32x32xf32> to vector<1xf32>
    %66 = vector.shape_cast %65 : vector<1xf32> to vector<1x1x1xf32>
    %67 = vector.extract %66[0, 0, 0] : f32 from vector<1x1x1xf32>
    %68 = arith.mulf %67, %37 : f32
    %cst_15 = arith.constant 9.99999997E-7 : f32
    %69 = arith.addf %68, %cst_15 : f32
    %70 = arith.subf %24, %27 : vector<32x32xf32>
    %71 = arith.mulf %70, %30 : vector<32x32xf32>
    %72 = math.absf %71 : vector<32x32xf32>
    %73 = vector.shape_cast %72 : vector<32x32xf32> to vector<1x32x32xf32>
    %cst_16 = arith.constant dense<0.000000e+00> : vector<1xf32>
    %74 = vector.multi_reduction <add>, %73, %cst_16 [1, 2] : vector<1x32x32xf32> to vector<1xf32>
    %75 = vector.shape_cast %74 : vector<1xf32> to vector<1x1x1xf32>
    %76 = vector.extract %75[0, 0, 0] : f32 from vector<1x1x1xf32>
    %77 = vector.broadcast %43 : f32 to vector<32x32xf32>
    %78 = arith.subf %24, %77 : vector<32x32xf32>
    %cst_17 = arith.constant 1.000000e+00 : f32
    %79 = arith.divf %cst_17, %59 : f32
    %80 = vector.broadcast %79 : f32 to vector<32x32xf32>
    %81 = arith.mulf %78, %80 : vector<32x32xf32>
    %82 = vector.broadcast %49 : f32 to vector<32x32xf32>
    %83 = arith.subf %27, %82 : vector<32x32xf32>
    %cst_18 = arith.constant 1.000000e+00 : f32
    %84 = arith.divf %cst_18, %69 : f32
    %85 = vector.broadcast %84 : f32 to vector<32x32xf32>
    %86 = arith.mulf %83, %85 : vector<32x32xf32>
    %87 = arith.subf %81, %86 : vector<32x32xf32>
    %88 = arith.mulf %87, %30 : vector<32x32xf32>
    %89 = math.absf %88 : vector<32x32xf32>
    %90 = vector.shape_cast %89 : vector<32x32xf32> to vector<1x32x32xf32>
    %cst_19 = arith.constant dense<0.000000e+00> : vector<1xf32>
    %91 = vector.multi_reduction <add>, %90, %cst_19 [1, 2] : vector<1x32x32xf32> to vector<1xf32>
    %92 = vector.shape_cast %91 : vector<1xf32> to vector<1x1x1xf32>
    %93 = vector.extract %92[0, 0, 0] : f32 from vector<1x1x1xf32>
    %94 = vector.extract_strided_slice %88 {offsets = [0, 0], sizes = [30, 32], strides = [1, 1]} : vector<32x32xf32> to vector<30x32xf32>
    %95 = vector.extract_strided_slice %88 {offsets = [1, 0], sizes = [30, 32], strides = [1, 1]} : vector<32x32xf32> to vector<30x32xf32>
    %cst_20 = arith.constant 2.000000e+00 : f32
    %96 = vector.broadcast %cst_20 : f32 to vector<30x32xf32>
    %97 = arith.mulf %96, %95 : vector<30x32xf32>
    %98 = arith.addf %94, %97 : vector<30x32xf32>
    %99 = vector.extract_strided_slice %88 {offsets = [2, 0], sizes = [30, 32], strides = [1, 1]} : vector<32x32xf32> to vector<30x32xf32>
    %100 = arith.addf %98, %99 : vector<30x32xf32>
    %101 = vector.extract_strided_slice %88 {offsets = [2, 0], sizes = [30, 32], strides = [1, 1]} : vector<32x32xf32> to vector<30x32xf32>
    %102 = vector.extract_strided_slice %88 {offsets = [0, 0], sizes = [30, 32], strides = [1, 1]} : vector<32x32xf32> to vector<30x32xf32>
    %103 = arith.subf %101, %102 : vector<30x32xf32>
    %104 = vector.extract_strided_slice %100 {offsets = [0, 2], sizes = [30, 30], strides = [1, 1]} : vector<30x32xf32> to vector<30x30xf32>
    %105 = vector.extract_strided_slice %100 {offsets = [0, 0], sizes = [30, 30], strides = [1, 1]} : vector<30x32xf32> to vector<30x30xf32>
    %106 = arith.subf %104, %105 : vector<30x30xf32>
    %107 = vector.extract_strided_slice %103 {offsets = [0, 0], sizes = [30, 30], strides = [1, 1]} : vector<30x32xf32> to vector<30x30xf32>
    %108 = vector.extract_strided_slice %103 {offsets = [0, 1], sizes = [30, 30], strides = [1, 1]} : vector<30x32xf32> to vector<30x30xf32>
    %cst_21 = arith.constant 2.000000e+00 : f32
    %109 = vector.broadcast %cst_21 : f32 to vector<30x30xf32>
    %110 = arith.mulf %109, %108 : vector<30x30xf32>
    %111 = arith.addf %107, %110 : vector<30x30xf32>
    %112 = vector.extract_strided_slice %103 {offsets = [0, 2], sizes = [30, 30], strides = [1, 1]} : vector<30x32xf32> to vector<30x30xf32>
    %113 = arith.addf %111, %112 : vector<30x30xf32>
    %114 = math.absf %106 : vector<30x30xf32>
    %115 = math.absf %113 : vector<30x30xf32>
    %116 = arith.addf %114, %115 : vector<30x30xf32>
    %117 = vector.shape_cast %116 : vector<30x30xf32> to vector<1x30x30xf32>
    %cst_22 = arith.constant dense<0.000000e+00> : vector<1xf32>
    %118 = vector.multi_reduction <add>, %117, %cst_22 [1, 2] : vector<1x30x30xf32> to vector<1xf32>
    %119 = vector.shape_cast %118 : vector<1xf32> to vector<1x1x1xf32>
    %120 = vector.extract %119[0, 0, 0] : f32 from vector<1x1x1xf32>
    %c0_23 = arith.constant 0 : index
    %c0_24 = arith.constant 0 : index
    %121 = vector.load %arg5[%c0_23, %c0_24] : memref<32x32xf32, #tpu.memory_space<vmem>>, vector<32x32xf32>
    tpu.vector_store %arg5[%c0_23, %c0_24], %88 {strides = array<i32>} : memref<32x32xf32, #tpu.memory_space<vmem>>, vector<32x32xf32>,
    %c0_25 = arith.constant 0 : index
    %c0_26 = arith.constant 0 : index
    %122 = tpu.strided_load %arg5[%c0_25, %c0_26] {strides = array<i32: 2, 1>} : memref<32x32xf32, #tpu.memory_space<vmem>>, vector<16x32xf32>
    %cst_27 = arith.constant dense<0.000000e+00> : vector<16x16xf32>
    %123 = tpu.matmul %122, %7, %cst_27 {dimension_numbers = #tpu.dot_dimension_numbers<[1], [0], [0], [1], [0, 0, 1, 1], [], []>} : vector<16x32xf32>, vector<32x16xf32>, vector<16x16xf32> -> vector<16x16xf32>
    %124 = vector.extract_strided_slice %123 {offsets = [0, 0], sizes = [14, 16], strides = [1, 1]} : vector<16x16xf32> to vector<14x16xf32>
    %125 = vector.extract_strided_slice %123 {offsets = [1, 0], sizes = [14, 16], strides = [1, 1]} : vector<16x16xf32> to vector<14x16xf32>
    %cst_28 = arith.constant 2.000000e+00 : f32
    %126 = vector.broadcast %cst_28 : f32 to vector<14x16xf32>
    %127 = arith.mulf %126, %125 : vector<14x16xf32>
    %128 = arith.addf %124, %127 : vector<14x16xf32>
    %129 = vector.extract_strided_slice %123 {offsets = [2, 0], sizes = [14, 16], strides = [1, 1]} : vector<16x16xf32> to vector<14x16xf32>
    %130 = arith.addf %128, %129 : vector<14x16xf32>
    %131 = vector.extract_strided_slice %123 {offsets = [2, 0], sizes = [14, 16], strides = [1, 1]} : vector<16x16xf32> to vector<14x16xf32>
    %132 = vector.extract_strided_slice %123 {offsets = [0, 0], sizes = [14, 16], strides = [1, 1]} : vector<16x16xf32> to vector<14x16xf32>
    %133 = arith.subf %131, %132 : vector<14x16xf32>
    %134 = vector.extract_strided_slice %130 {offsets = [0, 2], sizes = [14, 14], strides = [1, 1]} : vector<14x16xf32> to vector<14x14xf32>
    %135 = vector.extract_strided_slice %130 {offsets = [0, 0], sizes = [14, 14], strides = [1, 1]} : vector<14x16xf32> to vector<14x14xf32>
    %136 = arith.subf %134, %135 : vector<14x14xf32>
    %137 = vector.extract_strided_slice %133 {offsets = [0, 0], sizes = [14, 14], strides = [1, 1]} : vector<14x16xf32> to vector<14x14xf32>
    %138 = vector.extract_strided_slice %133 {offsets = [0, 1], sizes = [14, 14], strides = [1, 1]} : vector<14x16xf32> to vector<14x14xf32>
    %cst_29 = arith.constant 2.000000e+00 : f32
    %139 = vector.broadcast %cst_29 : f32 to vector<14x14xf32>
    %140 = arith.mulf %139, %138 : vector<14x14xf32>
    %141 = arith.addf %137, %140 : vector<14x14xf32>
    %142 = vector.extract_strided_slice %133 {offsets = [0, 2], sizes = [14, 14], strides = [1, 1]} : vector<14x16xf32> to vector<14x14xf32>
    %143 = arith.addf %141, %142 : vector<14x14xf32>
    %144 = math.absf %136 : vector<14x14xf32>
    %145 = math.absf %143 : vector<14x14xf32>
    %146 = arith.addf %144, %145 : vector<14x14xf32>
    %147 = vector.shape_cast %146 : vector<14x14xf32> to vector<1x14x14xf32>
    %cst_30 = arith.constant dense<0.000000e+00> : vector<1xf32>
    %148 = vector.multi_reduction <add>, %147, %cst_30 [1, 2] : vector<1x14x14xf32> to vector<1xf32>
    %149 = vector.shape_cast %148 : vector<1xf32> to vector<1x1x1xf32>
    %150 = vector.extract %149[0, 0, 0] : f32 from vector<1x1x1xf32>
    %151 = arith.addf %120, %150 : f32
    %c0_31 = arith.constant 0 : index
    %c0_32 = arith.constant 0 : index
    %152 = vector.load %arg6[%c0_31, %c0_32] : memref<16x16xf32, #tpu.memory_space<vmem>>, vector<16x16xf32>
    tpu.vector_store %arg6[%c0_31, %c0_32], %123 {strides = array<i32>} : memref<16x16xf32, #tpu.memory_space<vmem>>, vector<16x16xf32>,
    %c0_33 = arith.constant 0 : index
    %c0_34 = arith.constant 0 : index
    %153 = tpu.strided_load %arg6[%c0_33, %c0_34] {strides = array<i32: 2, 1>} : memref<16x16xf32, #tpu.memory_space<vmem>>, vector<8x16xf32>
    %cst_35 = arith.constant dense<0.000000e+00> : vector<8x8xf32>
    %154 = tpu.matmul %153, %14, %cst_35 {dimension_numbers = #tpu.dot_dimension_numbers<[1], [0], [0], [1], [0, 0, 1, 1], [], []>} : vector<8x16xf32>, vector<16x8xf32>, vector<8x8xf32> -> vector<8x8xf32>
    %155 = vector.extract_strided_slice %154 {offsets = [0, 0], sizes = [6, 8], strides = [1, 1]} : vector<8x8xf32> to vector<6x8xf32>
    %156 = vector.extract_strided_slice %154 {offsets = [1, 0], sizes = [6, 8], strides = [1, 1]} : vector<8x8xf32> to vector<6x8xf32>
    %cst_36 = arith.constant 2.000000e+00 : f32
    %157 = vector.broadcast %cst_36 : f32 to vector<6x8xf32>
    %158 = arith.mulf %157, %156 : vector<6x8xf32>
    %159 = arith.addf %155, %158 : vector<6x8xf32>
    %160 = vector.extract_strided_slice %154 {offsets = [2, 0], sizes = [6, 8], strides = [1, 1]} : vector<8x8xf32> to vector<6x8xf32>
    %161 = arith.addf %159, %160 : vector<6x8xf32>
    %162 = vector.extract_strided_slice %154 {offsets = [2, 0], sizes = [6, 8], strides = [1, 1]} : vector<8x8xf32> to vector<6x8xf32>
    %163 = vector.extract_strided_slice %154 {offsets = [0, 0], sizes = [6, 8], strides = [1, 1]} : vector<8x8xf32> to vector<6x8xf32>
    %164 = arith.subf %162, %163 : vector<6x8xf32>
    %165 = vector.extract_strided_slice %161 {offsets = [0, 2], sizes = [6, 6], strides = [1, 1]} : vector<6x8xf32> to vector<6x6xf32>
    %166 = vector.extract_strided_slice %161 {offsets = [0, 0], sizes = [6, 6], strides = [1, 1]} : vector<6x8xf32> to vector<6x6xf32>
    %167 = arith.subf %165, %166 : vector<6x6xf32>
    %168 = vector.extract_strided_slice %164 {offsets = [0, 0], sizes = [6, 6], strides = [1, 1]} : vector<6x8xf32> to vector<6x6xf32>
    %169 = vector.extract_strided_slice %164 {offsets = [0, 1], sizes = [6, 6], strides = [1, 1]} : vector<6x8xf32> to vector<6x6xf32>
    %cst_37 = arith.constant 2.000000e+00 : f32
    %170 = vector.broadcast %cst_37 : f32 to vector<6x6xf32>
    %171 = arith.mulf %170, %169 : vector<6x6xf32>
    %172 = arith.addf %168, %171 : vector<6x6xf32>
    %173 = vector.extract_strided_slice %164 {offsets = [0, 2], sizes = [6, 6], strides = [1, 1]} : vector<6x8xf32> to vector<6x6xf32>
    %174 = arith.addf %172, %173 : vector<6x6xf32>
    %175 = math.absf %167 : vector<6x6xf32>
    %176 = math.absf %174 : vector<6x6xf32>
    %177 = arith.addf %175, %176 : vector<6x6xf32>
    %178 = vector.shape_cast %177 : vector<6x6xf32> to vector<1x6x6xf32>
    %cst_38 = arith.constant dense<0.000000e+00> : vector<1xf32>
    %179 = vector.multi_reduction <add>, %178, %cst_38 [1, 2] : vector<1x6x6xf32> to vector<1xf32>
    %180 = vector.shape_cast %179 : vector<1xf32> to vector<1x1x1xf32>
    %181 = vector.extract %180[0, 0, 0] : f32 from vector<1x1x1xf32>
    %182 = arith.addf %151, %181 : f32
    %c0_39 = arith.constant 0 : index
    %c0_40 = arith.constant 0 : index
    %183 = vector.load %arg7[%c0_39, %c0_40] : memref<8x8xf32, #tpu.memory_space<vmem>>, vector<8x8xf32>
    tpu.vector_store %arg7[%c0_39, %c0_40], %154 {strides = array<i32>} : memref<8x8xf32, #tpu.memory_space<vmem>>, vector<8x8xf32>,
    %c0_41 = arith.constant 0 : index
    %c0_42 = arith.constant 0 : index
    %184 = tpu.strided_load %arg7[%c0_41, %c0_42] {strides = array<i32: 2, 1>} : memref<8x8xf32, #tpu.memory_space<vmem>>, vector<4x8xf32>
    %cst_43 = arith.constant dense<0.000000e+00> : vector<4x4xf32>
    %185 = tpu.matmul %184, %21, %cst_43 {dimension_numbers = #tpu.dot_dimension_numbers<[1], [0], [0], [1], [0, 0, 1, 1], [], []>} : vector<4x8xf32>, vector<8x4xf32>, vector<4x4xf32> -> vector<4x4xf32>
    %186 = vector.extract_strided_slice %185 {offsets = [0, 0], sizes = [2, 4], strides = [1, 1]} : vector<4x4xf32> to vector<2x4xf32>
    %187 = vector.extract_strided_slice %185 {offsets = [1, 0], sizes = [2, 4], strides = [1, 1]} : vector<4x4xf32> to vector<2x4xf32>
    %cst_44 = arith.constant 2.000000e+00 : f32
    %188 = vector.broadcast %cst_44 : f32 to vector<2x4xf32>
    %189 = arith.mulf %188, %187 : vector<2x4xf32>
    %190 = arith.addf %186, %189 : vector<2x4xf32>
    %191 = vector.extract_strided_slice %185 {offsets = [2, 0], sizes = [2, 4], strides = [1, 1]} : vector<4x4xf32> to vector<2x4xf32>
    %192 = arith.addf %190, %191 : vector<2x4xf32>
    %193 = vector.extract_strided_slice %185 {offsets = [2, 0], sizes = [2, 4], strides = [1, 1]} : vector<4x4xf32> to vector<2x4xf32>
    %194 = vector.extract_strided_slice %185 {offsets = [0, 0], sizes = [2, 4], strides = [1, 1]} : vector<4x4xf32> to vector<2x4xf32>
    %195 = arith.subf %193, %194 : vector<2x4xf32>
    %196 = vector.extract_strided_slice %192 {offsets = [0, 2], sizes = [2, 2], strides = [1, 1]} : vector<2x4xf32> to vector<2x2xf32>
    %197 = vector.extract_strided_slice %192 {offsets = [0, 0], sizes = [2, 2], strides = [1, 1]} : vector<2x4xf32> to vector<2x2xf32>
    %198 = arith.subf %196, %197 : vector<2x2xf32>
    %199 = vector.extract_strided_slice %195 {offsets = [0, 0], sizes = [2, 2], strides = [1, 1]} : vector<2x4xf32> to vector<2x2xf32>
    %200 = vector.extract_strided_slice %195 {offsets = [0, 1], sizes = [2, 2], strides = [1, 1]} : vector<2x4xf32> to vector<2x2xf32>
    %cst_45 = arith.constant 2.000000e+00 : f32
    %201 = vector.broadcast %cst_45 : f32 to vector<2x2xf32>
    %202 = arith.mulf %201, %200 : vector<2x2xf32>
    %203 = arith.addf %199, %202 : vector<2x2xf32>
    %204 = vector.extract_strided_slice %195 {offsets = [0, 2], sizes = [2, 2], strides = [1, 1]} : vector<2x4xf32> to vector<2x2xf32>
    %205 = arith.addf %203, %204 : vector<2x2xf32>
    %206 = math.absf %198 : vector<2x2xf32>
    %207 = math.absf %205 : vector<2x2xf32>
    %208 = arith.addf %206, %207 : vector<2x2xf32>
    %209 = vector.shape_cast %208 : vector<2x2xf32> to vector<1x2x2xf32>
    %cst_46 = arith.constant dense<0.000000e+00> : vector<1xf32>
    %210 = vector.multi_reduction <add>, %209, %cst_46 [1, 2] : vector<1x2x2xf32> to vector<1xf32>
    %211 = vector.shape_cast %210 : vector<1xf32> to vector<1x1x1xf32>
    %212 = vector.extract %211[0, 0, 0] : f32 from vector<1x1x1xf32>
    %213 = arith.addf %182, %212 : f32
    %c0_i32_47 = arith.constant 0 : i32
    %214 = vector.broadcast %c0_i32_47 : i32 to vector<8x128xi32>
    %215 = arith.cmpi eq, %0, %214 : vector<8x128xi32>
    %cst_48 = arith.constant 0.000000e+00 : f32
    %216 = vector.broadcast %34 : f32 to vector<8x128xf32>
    %217 = vector.broadcast %cst_48 : f32 to vector<8x128xf32>
    %218 = arith.select %215, %216, %217 : vector<8x128xi1>, vector<8x128xf32>
    %c1_i32 = arith.constant 1 : i32
    %219 = vector.broadcast %c1_i32 : i32 to vector<8x128xi32>
    %220 = arith.cmpi eq, %0, %219 : vector<8x128xi32>
    %cst_49 = arith.constant 0.000000e+00 : f32
    %221 = vector.broadcast %76 : f32 to vector<8x128xf32>
    %222 = vector.broadcast %cst_49 : f32 to vector<8x128xf32>
    %223 = arith.select %220, %221, %222 : vector<8x128xi1>, vector<8x128xf32>
    %224 = arith.addf %218, %223 : vector<8x128xf32>
    %c2_i32_50 = arith.constant 2 : i32
    %225 = vector.broadcast %c2_i32_50 : i32 to vector<8x128xi32>
    %226 = arith.cmpi eq, %0, %225 : vector<8x128xi32>
    %cst_51 = arith.constant 0.000000e+00 : f32
    %227 = vector.broadcast %93 : f32 to vector<8x128xf32>
    %228 = vector.broadcast %cst_51 : f32 to vector<8x128xf32>
    %229 = arith.select %226, %227, %228 : vector<8x128xi1>, vector<8x128xf32>
    %230 = arith.addf %224, %229 : vector<8x128xf32>
    %c3_i32 = arith.constant 3 : i32
    %231 = vector.broadcast %c3_i32 : i32 to vector<8x128xi32>
    %232 = arith.cmpi eq, %0, %231 : vector<8x128xi32>
    %cst_52 = arith.constant 0.000000e+00 : f32
    %233 = vector.broadcast %213 : f32 to vector<8x128xf32>
    %234 = vector.broadcast %cst_52 : f32 to vector<8x128xf32>
    %235 = arith.select %232, %233, %234 : vector<8x128xi1>, vector<8x128xf32>
    %236 = arith.addf %230, %235 : vector<8x128xf32>
    %237 = arith.index_cast %c0_i32 : i32 to index
    %c0_53 = arith.constant 0 : index
    %c0_54 = arith.constant 0 : index
    %238 = vector.load %arg4[%237, %c0_53, %c0_54] : memref<1x8x128xf32, #tpu.memory_space<vmem>>, vector<1x8x128xf32>
    %239 = vector.shape_cast %238 : vector<1x8x128xf32> to vector<8x128xf32>
    %240 = vector.shape_cast %236 : vector<8x128xf32> to vector<1x8x128xf32>
    tpu.vector_store %arg4[%237, %c0_53, %c0_54], %240 {strides = array<i32>} : memref<1x8x128xf32, #tpu.memory_space<vmem>>, vector<1x8x128xf32>,
    %c1_i32_55 = arith.constant 1 : i32
    return
  }
  func.func @transform_0(%arg0: i32) -> (i32, i32, i32) {
    %c0_i32 = arith.constant 0 : i32
    %c0_i32_0 = arith.constant 0 : i32
    %c0_i32_1 = arith.constant 0 : i32
    return %arg0, %c0_i32, %c0_i32_0 : i32, i32, i32
  }
  func.func @transform_1(%arg0: i32) -> (i32, i32, i32) {
    %c0_i32 = arith.constant 0 : i32
    %c0_i32_0 = arith.constant 0 : i32
    %c0_i32_1 = arith.constant 0 : i32
    return %arg0, %c0_i32, %c0_i32_0 : i32, i32, i32
  }
  func.func @transform_2(%arg0: i32) -> (i32, i32, i32) {
    %c0_i32 = arith.constant 0 : i32
    %c0_i32_0 = arith.constant 0 : i32
    %c0_i32_1 = arith.constant 0 : i32
    return %arg0, %c0_i32, %c0_i32_0 : i32, i32, i32
  }
  func.func @transform_3(%arg0: i32) -> (i32, i32, i32) {
    %c0_i32 = arith.constant 0 : i32
    %c0_i32_0 = arith.constant 0 : i32
    %c0_i32_1 = arith.constant 0 : i32
    return %arg0, %c0_i32, %c0_i32_0 : i32, i32, i32
  }
}

</mosaic_0001>

<bundles_post_ra>
// kernel: tpu_custom_call.1
= control target key start
LH: loop header
LB: loop body
LE: loop exit
PB: predicated region body
PF: predicated region fallthrough
CT: control target
= control target key end

     0   :  { %s1995_s0 = inlined_call_operand.hbm [shape: f32[2,32,32], index: 0, kind: input, shape index: {}]   ;;  %s1996_s1 = inlined_call_operand.hbm [shape: f32[2,32,32], index: 1, kind: input, shape index: {}]   ;;  %s1997_s2 = inlined_call_operand.hbm [shape: f32[2,32,32], index: 2, kind: input, shape index: {}]   ;;  %s1998_s3 = inlined_call_operand.hbm [shape: f32[2,8,128], index: 3, kind: output, shape index: {}]  }
   0x1   :  { %2001 = sst [smem:[#allocation16_spill]] %s1995_s0 }
   0x2   :  { %2002 = sst [smem:[#allocation17_spill]] %s1996_s1 }
   0x3   :  { %8 = vsyncpa [#allocation6], 0 }
   0x4   :  { %10 = vsyncpa [#allocation6 + $0x1], 0 }
   0x5   :  { %11 = vsyncpa [#allocation9], 0 }
   0x6   :  { %13 = vsyncpa [#allocation9 + $0x1], 0 }
   0x7   :  { %14 = vsyncpa [#allocation7], 0 }
   0x8   :  { %16 = vsyncpa [#allocation7 + $0x1], 0  ;;  %s1498_s12 = smov 0   ;;  %s1500_s13 = smov 0  }
   0x9   :  { %s1502_s14 = smov 0   ;;  %s1504_s15 = smov 0  }
   0xa LB: > { %s1519_s16 = sadd.s32 4294967295, %s1470_s15   ;;  %s1171_s17 = sadd.s32 4294967294, %s1470_s15   ;;  %s1470_s15 = sphi %s1504_s15, %s2016_s15   ;;  %s1466_s14 = sphi %s1502_s14, %s2015_s14   ;;  %s1462_s13 = sphi %s1500_s13, %s2014_s13   ;;  %s1458_s12 = sphi %s1498_s12, %s2013_s12  }
   0xb   : > { %s1523_s18 = sadd.s32 1, %s1470_s15   ;;  %s29_s19 = sadd.s32 1, %s1466_s14 }
   0xc   : > { %s26_s20 = ssub.s32 %s1470_s15, %s1523_s18  ;;  %p36_p0 = scmp.ne.s32.totalorder %s1466_s14, %s1462_s13 }
   0xd   : > { %p27_p1 = scmp.eq.s32.totalorder %s26_s20, 0  ;;  %p37_p2 = scmp.eq.s32.totalorder %s1470_s15, 0 }
   0xe   : > { %p42_p3 = scmp.ne.s32.totalorder %s1462_s13, %s1458_s12  ;;  %p43_p4 = scmp.eq.s32.totalorder %s1519_s16, 0 }
   0xf   : > { %s1535_s21 = scalar_select %p27_p1, %s1466_s14, %s29_s19  }
  0x10   : > { %p38_p5 = por %p37_p2, %p36_p0  ;;  %p1537_p6 = por %p43_p4, %p42_p3 }
  0x11   : > { %2003 = sst [smem:[#allocation15_spill]] %s1535_s21  ;;  %p118_p7 = scmp.eq.s32.totalorder %s1519_s16, 1 }
  0x12   : > { %p124_p8 = scmp.eq.s32.totalorder %s1171_s17, 1  ;;  %p1173_p9 = scmp.ge.s32.totalorder %s1470_s15, 2 }
  0x13   : > { %p1264_p10 = scmp.lt.s32.totalorder %s1470_s15, 2  ;;  %p1544_p11 = por %p118_p7, %p36_p0 }
  0x14   : > { %p1548_p12 = por %p124_p8, %p42_p3  ;;  %s144_s25 = sand.u32 1, %s1466_s14  }
  0x15   : > { %s1554_s26 = sshll.u32 %s1470_s15, 5  ;;  %s1558_s27 = sshll.u32 %s144_s25, 5 }
  0x16   : > { %p1560_p13 = pnand %p1264_p10, %p38_p5  ;;  %s166_s29 = sand.u32 1, %s1470_s15  }
  0x17   : > { %s2008_s1 = sld [smem:[#allocation17_spill]]  ;;  %s170_s6 = scalar_lea.vmem [#allocation8], %s1558_s27 }
  0x18   : > { %s178_s7 = sshll.u32 %s170_s6, 4  ;;  %p1183_p0 = scmp.ge.s32.totalorder %s1470_s15, 1  ;;  %s179_s7 = int_to_ptr.vmem [resolvable:$true] %s178_s7 }
  0x19   : > { %s1571_s9 = scalar_lea.sflag [#allocation9], %s166_s29  ;;  %p1314_p2 = pneg %p1560_p13 }
  0x1d   : > { %s175_s5 = scalar_lea.hbm %s2008_s1, %s1554_s26  ;;  %s1317_s20 = scalar_lea.hbm %s2008_s1, 64 }
  0x1e   : > { %s176_s8 = sshll.u32 %s175_s5, 4  ;;  %s177_s8 = int_to_ptr.hbm [resolvable:$true] %s176_s8 }
  0x1f   : > { %s1310_s10 = sshra.s32 %s177_s8, 4  ;;  %s1311_s10 = int_to_ptr.hbm [resolvable:$true] %s1310_s10 }
  0x20   : > { %s1312_s11 = scalar_lea.hbm %s1311_s10, 32  ;;  %p1318_p5 = scmp.lt.s32.totalorder %s1311_s10, %s2008_s1 }
  0x21   : > { %p1313_p1 = scmp.ne.s32.totalorder %s1311_s10, %s1312_s11  ;;  %p1319_p7 = scmp.lt.s32.totalorder %s1317_s20, %s1312_s11 }
  0x23   : > { %p1315_p3 = pnand %p1314_p2, %p1313_p1  ;;  %p1320_p8 = por %p1319_p7, %p1318_p5 }
  0x25   : > { %p1316_p4 = pneg %p1315_p3 }
  0x27   : > { %p1321_p10 = pnand %p1320_p8, %p1316_p4 }
  0x29   : > { %1324 = shalt.err (!%p1321_p10)
}
  0x2a   : > { %s1999_s29 = smov 128   ;;  %s1473_s5 = smov 8  }
  0x2b   : > { %1256 = dma.hbm_to_vmem [thread:$0]  (!%p1560_p13), %s177_s8, 512, %s179_s7, %s1571_s9, %s1999_s29, %s1999_s29, %s1473_s5  }
  0x2c   : > { %p208_p1 = scmp.lt.s32.totalorder %s1470_s15, 3  ;;  %s2009_s0 = sld [smem:[#allocation16_spill]] }
  0x2d   : > { %s148_s20 = scalar_lea.vmem [#allocation5], %s1558_s27  ;;  %s145_s4 = scalar_lea.sflag [#allocation6], %s144_s25 }
  0x2e   : > { %p1597_p3 = pnand %p1183_p0, %p208_p1  ;;  %s156_s30 = sshll.u32 %s148_s20, 4  ;;  %s157_s30 = int_to_ptr.vmem [resolvable:$true] %s156_s30 }
  0x32   : > { %s153_s11 = scalar_lea.hbm %s2009_s0, %s1554_s26  ;;  %s1347_s10 = scalar_lea.hbm %s2009_s0, 64 }
  0x33   : > { %s154_s19 = sshll.u32 %s153_s11, 4  ;;  %s155_s19 = int_to_ptr.hbm [resolvable:$true] %s154_s19 }
  0x34   : > { %s1340_s1 = sshra.s32 %s155_s19, 4  ;;  %s1341_s1 = int_to_ptr.hbm [resolvable:$true] %s1340_s1 }
  0x35   : > { %s1342_s7 = scalar_lea.hbm %s1341_s1, 32  ;;  %p1348_p0 = scmp.lt.s32.totalorder %s1341_s1, %s2009_s0 }
  0x36   : > { %p1343_p4 = scmp.ne.s32.totalorder %s1341_s1, %s1342_s7  ;;  %p1349_p8 = scmp.lt.s32.totalorder %s1347_s10, %s1342_s7 }
  0x38   : > { %p1345_p5 = pnand %p1343_p4, %p1314_p2  ;;  %p1350_p10 = por %p1349_p8, %p1348_p0 }
  0x3a   : > { %p1346_p7 = pneg %p1345_p5 }
  0x3c   : > { %p1351_p1 = pnand %p1350_p10, %p1346_p7 }
  0x3e   : > { %1354 = shalt.err (!%p1351_p1)
}
  0x3f   : > { %s2011_s25 = smov 128   ;;  %s197_s6 = scalar_lea.hbm %s1997_s2, %s1554_s26 }
  0x40   : > { %1253 = dma.hbm_to_vmem [thread:$0]  (!%p1560_p13), %s155_s19, 512, %s157_s30, %s145_s4, %s2011_s25, %s2011_s25, %s1473_s5  }
  0x41   : > { %s192_s21 = scalar_lea.vmem [#allocation10], %s1558_s27  ;;  %s198_s1 = sshll.u32 %s197_s6, 4  ;;  %s199_s1 = int_to_ptr.hbm [resolvable:$true] %s198_s1 }
  0x42   : > { %s200_s29 = sshll.u32 %s192_s21, 4  ;;  %s1370_s7 = sshra.s32 %s199_s1, 4  ;;  %s201_s29 = int_to_ptr.vmem [resolvable:$true] %s200_s29  ;;  %s1371_s7 = int_to_ptr.hbm [resolvable:$true] %s1370_s7 }
  0x43   : > { %s1372_s10 = scalar_lea.hbm %s1371_s7, 32  ;;  %s1377_s19 = scalar_lea.hbm %s1997_s2, 64 }
  0x44   : > { %p1373_p4 = scmp.ne.s32.totalorder %s1371_s7, %s1372_s10  ;;  %p1378_p0 = scmp.lt.s32.totalorder %s1371_s7, %s1997_s2 }
  0x45   : > { %p1379_p8 = scmp.lt.s32.totalorder %s1377_s19, %s1372_s10 }
  0x46   : > { %p1375_p5 = pnand %p1373_p4, %p1314_p2 }
  0x47   : > { %p1380_p10 = por %p1379_p8, %p1378_p0 }
  0x48   : > { %p1376_p7 = pneg %p1375_p5 }
  0x4a   : > { %p1381_p1 = pnand %p1380_p10, %p1376_p7 }
  0x4c   : > { %1384 = shalt.err (!%p1381_p1)
}
  0x4d   : > { %1259 = dma.hbm_to_vmem [thread:$0]  (!%p1560_p13), %s199_s1, 512, %s201_s29, %s1571_s9, %s2011_s25, %s2011_s25, %s1473_s5  }
  0x4e   : > { %212 = sbr.rel (%p1597_p3) target bundleno = 1564 (0x61c), region = 32  ;;  %s1641_s0 = sand.u32 (!%p1597_p3), 1, %s1462_s13  }
  0x4f   : > { %s1184_s21 = sshll.u32 (!%p1597_p3), %s1641_s0, 5  ;;  %s215_s26 = scalar_lea.sflag (!%p1597_p3), [#allocation6], %s1641_s0 }
  0x50   : > { %s218_s27 = scalar_lea.vmem (!%p1597_p3), [#allocation5], %s1184_s21 }
  0x53   : > { %1445 = dma.done.wait (%p1537_p6), %s215_s26, 512  }
  0x54   : > { %1447 = vsyncadd (%p1537_p6), %s215_s26, 4294966784  ;;  %s224_s28 = sand.u32 1, %s1519_s16   ;;  %s228_s5 = scalar_lea.vmem [#allocation8], %s1184_s21 }
  0x55   : > { %s225_s9 = scalar_lea.sflag [#allocation9], %s224_s28 }
  0x56   : > { %1449 = dma.done.wait (%p1537_p6), %s225_s9, 1024  }
  0x57   : > { %1451 = vsyncadd (%p1537_p6), %s225_s9, 4294966272  ;;  %vm304_vm0 = vcmask 261120   ;;  %s238_s17 = scalar_lea.vmem [#allocation10], %s1184_s21  ;;  %v1668_v7 = vld [vmem:[%s228_s5] sm:$0xff]  ;;  %v1670_v8 = vld [vmem:[%s228_s5 + $0x8] sm:$0xff]  ;;  %s1475_s28 = smov 126  }
  0x58   : > { %v1654_v0 = vld [vmem:[%s238_s17] sm:$0xff]  ;;  %v1656_v1 = vld [vmem:[%s238_s17 + $0x8] sm:$0xff]  ;;  %v1658_v2 = vld [vmem:[%s238_s17 + $0x10] sm:$0xff]  ;;  %s1476_s9 = smov 127  }
  0x59   : > { %v1660_v3 = vld [vmem:[%s238_s17 + $0x18] sm:$0xff]  ;;  %v305_v4 = vsel %vm304_vm0, %v1654_v0, 0.0  ;;  %v306_v5 = vsel %vm304_vm0, %v1656_v1, 0.0  ;;  %v308_v6 = vsel %vm304_vm0, %v1658_v2, 0.0  ;;  %v1672_v10 = vld [vmem:[%s228_s5 + $0x10] sm:$0xff]  ;;  %v360_v12 = vmul.f32 %v1654_v0, %v1668_v7  ;;  %v1680_v14 = vld [vmem:[%s218_s27] sm:$0xff] }
  0x5a   : > { %v307_v9 = vadd.f32 %v306_v5, %v305_v4  ;;  %v1674_v11 = vld [vmem:[%s228_s5 + $0x18] sm:$0xff]  ;;  %v361_v13 = vmul.f32 %v1656_v1, %v1670_v8  ;;  %v310_v15 = vsel %vm304_vm0, %v1660_v3, 0.0  ;;  %v362_v16 = vmul.f32 %v1658_v2, %v1672_v10  ;;  %v1688_v18 = vld [vmem:[%s218_s27 + $0x8] sm:$0xff]  ;;  %v1690_v19 = vld [vmem:[%s218_s27 + $0x10] sm:$0xff]  ;;  %s1477_s5 = smov 2  }
  0x5b   : > { %v363_v17 = vmul.f32 %v1660_v3, %v1674_v11  ;;  %v1692_v20 = vld [vmem:[%s218_s27 + $0x18] sm:$0xff]  ;;  %v339_v21 = vmul.f32 %v1654_v0, %v1680_v14  ;;  %v364_v23 = vsel %vm304_vm0, %v360_v12, 0.0  ;;  %v340_v25 = vmul.f32 %v1656_v1, %v1688_v18 }
  0x5c   : > { %v309_v22 = vadd.f32 %v308_v6, %v307_v9  ;;  %v365_v24 = vsel %vm304_vm0, %v361_v13, 0.0  ;;  %v367_v27 = vsel %vm304_vm0, %v362_v16, 0.0  ;;  %v341_v29 = vmul.f32 %v1658_v2, %v1690_v19 }
  0x5d   : > { %v366_v26 = vadd.f32 %v365_v24, %v364_v23  ;;  %v369_v28 = vsel %vm304_vm0, %v363_v17, 0.0  ;;  %v342_v31 = vmul.f32 %v1660_v3, %v1692_v20  ;;  %v343_v32 = vsel %vm304_vm0, %v339_v21, 0.0 }
  0x5e   : > { %v311_v30 = vadd.f32 %v310_v15, %v309_v22  ;;  %v344_v33 = vsel %vm304_vm0, %v340_v25, 0.0  ;;  %v346_v36 = vsel %vm304_vm0, %v341_v29, 0.0  ;;  %v443_v21 = vsub.f32 %v1680_v14, %v1668_v7 }
  0x5f   : > { %v368_v34 = vadd.f32 %v367_v27, %v366_v26  ;;  %v345_v35 = vadd.f32 %v344_v33, %v343_v32  ;;  %v348_v39 = vsel %vm304_vm0, %v342_v31, 0.0  ;;  %v444_v22 = vsub.f32 %v1688_v18, %v1670_v8 }
  0x60   : > { %312 = vadd.xlane.f32.xlu0 %v311_v30  ;;  %v445_v23 = vsub.f32 %v1690_v19, %v1672_v10  ;;  %v447_v24 = vmul.f32 %v443_v21, %v1654_v0  ;;  %v446_v25 = vsub.f32 %v1692_v20, %v1674_v11 }
  0x61   : > { %v370_v37 = vadd.f32 %v369_v28, %v368_v34  ;;  %v347_v38 = vadd.f32 %v346_v36, %v345_v35  ;;  %v448_v26 = vmul.f32 %v444_v22, %v1656_v1 }
  0x62   : > { %v449_v27 = vmul.f32 %v445_v23, %v1658_v2  ;;  %v451_v29 = vand.u32 2147483647, %v447_v24  ;;  %v450_v35 = vmul.f32 %v446_v25, %v1660_v3 }
  0x63   : > { %371 = vadd.xlane.f32.xlu1 %v370_v37  ;;  %v349_v40 = vadd.f32 %v348_v39, %v347_v38  ;;  %v452_v36 = vand.u32 2147483647, %v448_v26 }
  0x64   : > { %v453_v37 = vand.u32 2147483647, %v449_v27 }
  0x68   : > { %350 = vadd.xlane.f32.xlu0 %v349_v40 }
  0xd3   : > { %v313_v41 = vpop.xlane.xlu0 %312 }
  0xd4   : > { %v314_v42 = vrot.slane %v313_v41, 4 }
  0xd6   : > { %v315_v43 = vadd.f32 %v314_v42, %v313_v41  ;;  %v372_v49 = vpop.xlane.xlu1 %371 }
  0xd7   : > { %v373_v51 = vrot.slane %v372_v49, 4 }
  0xd8   : > { %v316_v44 = vrot.slane %v315_v43, 2 }
  0xd9   : > { %v374_v54 = vadd.f32 %v373_v51, %v372_v49 }
  0xda   : > { %v317_v45 = vadd.f32 %v316_v44, %v315_v43 }
  0xdb   : > { %v351_v48 = vpop.xlane.xlu0 %350  ;;  %v375_v56 = vrot.slane %v374_v54, 2 }
  0xdc   : > { %v318_v46 = vrot.slane %v317_v45, 1  ;;  %v352_v50 = vrot.slane %v351_v48, 4 }
  0xdd   : > { %v376_v61 = vadd.f32 %v375_v56, %v374_v54 }
  0xde   : > { %v319_v47 = vadd.f32 %v318_v46, %v317_v45  ;;  %v353_v53 = vadd.f32 %v352_v50, %v351_v48 }
  0xdf   : > { %v377_v9 = vrot.slane %v376_v61, 1 }
  0xe0   : > { %1214 = vpush %v319_v47  ;;  %v354_v55 = vrot.slane %v353_v53, 2 }
  0xe1   : > { %v378_v17 = vadd.f32 %v377_v9, %v376_v61  ;;  %v458_v9 = vsel %vm304_vm0, %v453_v37, 0.0 }
  0xe2   : > { %v355_v59 = vadd.f32 %v354_v55, %v353_v53  ;;  %v456_v53 = vsel %vm304_vm0, %v452_v36, 0.0 }
  0xe4   : > { %v356_v5 = vrot.slane %v355_v59, 1 }
  0xe6   : > { %v357_v16 = vadd.f32 %v356_v5, %v355_v59 }
 0x111   : > { %s1710_s22 = spop %1214 }
 0x112   : > { %p321_p6 = scmp.eq.f32.partialorder %s1710_s22, 0.0 }
 0x114   : > { %s322_s25 = scalar_select %p321_p6, 1e-06, %s1710_s22 }
 0x116   : > { %v323_v52 = vstv %s322_s25 }
 0x117   : > { %1304 = vrcp.f32 %v323_v52  ;;  %v335_v62 = vand.u32 2147483648, %v323_v52  ;;  %v333_v4 = vand.u32 2147483647, %v323_v52  ;;  %vm329_vm2 = vweird.f32 %v323_v52 }
 0x119   : > { %v336_v12 = vor.u32 1.1754944e-38, %v335_v62  ;;  %vm334_vm4 = vcmp.eq.f32.partialorder %v333_v4, 8.507059e+37 }
 0x11d   : > { %v1305_v57 = vpop.eup %1304 }
 0x11e   : > { %v325_v58 = vmul.f32 %v1305_v57, %v323_v52  ;;  %vm330_vm1 = vweird.f32 %v1305_v57  ;;  %v455_v52 = vsel %vm304_vm0, %v451_v29, 0.0 }
 0x11f   : > { %vm331_vm3 = vmor %vm329_vm2, %vm330_vm1  ;;  %v457_v4 = vadd.f32 %v456_v53, %v455_v52  ;;  %vm585_vm2 = vcmask 1041408  }
 0x120   : > { %v326_v60 = vsub.f32 1.0, %v325_v58 }
 0x122   : > { %v327_v63 = vmul.f32 %v1305_v57, %v326_v60 }
 0x124   : > { %v328_v6 = vadd.f32 %v1305_v57, %v327_v63 }
 0x126   : > { %v332_v13 = vsel %vm331_vm3, %v1305_v57, %v328_v6  ;;  %v454_v6 = vand.u32 2147483647, %v450_v35  ;;  %vm569_vm3 = vcmask 1045504  }
 0x127   : > { %v337_v15 = vsel %vm334_vm4, %v336_v12, %v332_v13  ;;  %v459_v13 = vadd.f32 %v458_v9, %v457_v4  ;;  %vm549_vm4 = vcmask 1046528  }
 0x128   : > { %1216 = vpush %v337_v15  ;;  %v460_v15 = vsel %vm304_vm0, %v454_v6, 0.0 }
 0x129   : > { %1218 = vpush %v357_v16  ;;  %v461_v16 = vadd.f32 %v460_v15, %v459_v13  ;;  %v1474_v13 = vmov 1.0  }
 0x12a   : > { %1220 = vpush %v378_v17 }
 0x159   : > { %s1720_s20 = spop %1216 }
 0x15a   : > { %s1219_s8 = spop %1218 }
 0x15b   : > { %s359_s6 = smul.f32 %s1219_s8, %s1720_s20  ;;  %s1221_s29 = spop %1220 }
 0x15c   : > { %s380_s1 = smul.f32 %s1221_s29, %s1720_s20  ;;  %s1187_s8 = sshll.u32 %s1641_s0, 3 }
 0x15d   : > { %v381_v28 = vstv %s359_s6  ;;  %s1204_s29 = sshll.u32 %s1519_s16, 3  ;;  %s271_s16 = scalar_lea.vmem [#allocation11], %s1187_s8 }
 0x15e   : > { %v1730_v30 = vsub.f32 %v1680_v14, %v381_v28  ;;  %v1733_v31 = vsub.f32 %v1688_v18, %v381_v28  ;;  %v1736_v32 = vsub.f32 %v1690_v19, %v381_v28  ;;  %v1739_v33 = vsub.f32 %v1692_v20, %v381_v28 }
 0x15f   : > { %v412_v34 = vstv %s380_s1 }
 0x160   : > { %v386_v38 = vmul.f32 %v1730_v30, %v1654_v0  ;;  %v387_v14 = vmul.f32 %v1733_v31, %v1656_v1  ;;  %v1747_v18 = vsub.f32 %v1668_v7, %v412_v34  ;;  %v1750_v19 = vsub.f32 %v1670_v8, %v412_v34 }
 0x161   : > { %v1753_v20 = vsub.f32 %v1672_v10, %v412_v34  ;;  %v1756_v39 = vsub.f32 %v1674_v11, %v412_v34  ;;  %v388_v40 = vmul.f32 %v1736_v32, %v1658_v2  ;;  %v389_v41 = vmul.f32 %v1739_v33, %v1660_v3 }
 0x162   : > { %v390_v42 = vand.u32 2147483647, %v386_v38  ;;  %v391_v43 = vand.u32 2147483647, %v387_v14  ;;  %v417_v7 = vmul.f32 %v1747_v18, %v1654_v0  ;;  %v418_v8 = vmul.f32 %v1750_v19, %v1656_v1 }
 0x163   : > { %v419_v10 = vmul.f32 %v1753_v20, %v1658_v2  ;;  %v420_v11 = vmul.f32 %v1756_v39, %v1660_v3  ;;  %v392_v44 = vand.u32 2147483647, %v388_v40  ;;  %v393_v45 = vand.u32 2147483647, %v389_v41 }
 0x164   : > { %v421_v46 = vand.u32 2147483647, %v417_v7  ;;  %v422_v47 = vand.u32 2147483647, %v418_v8  ;;  %v394_v48 = vsel %vm304_vm0, %v390_v42, 0.0  ;;  %v395_v49 = vsel %vm304_vm0, %v391_v43, 0.0 }
 0x165   : > { %v423_v50 = vand.u32 2147483647, %v419_v10  ;;  %v396_v51 = vadd.f32 %v395_v49, %v394_v48  ;;  %v424_v54 = vand.u32 2147483647, %v420_v11  ;;  %v397_v57 = vsel %vm304_vm0, %v392_v44, 0.0 }
 0x166   : > { %v425_v55 = vsel %vm304_vm0, %v421_v46, 0.0  ;;  %v426_v56 = vsel %vm304_vm0, %v422_v47, 0.0  ;;  %v399_v61 = vsel %vm304_vm0, %v393_v45, 0.0 }
 0x167   : > { %v427_v58 = vadd.f32 %v426_v56, %v425_v55  ;;  %v398_v59 = vadd.f32 %v397_v57, %v396_v51  ;;  %v428_v60 = vsel %vm304_vm0, %v423_v50, 0.0  ;;  %v430_v5 = vsel %vm304_vm0, %v424_v54, 0.0 }
 0x169   : > { %v429_v62 = vadd.f32 %v428_v60, %v427_v58  ;;  %v400_v63 = vadd.f32 %v399_v61, %v398_v59 }
 0x16b   : > { %v431_v12 = vadd.f32 %v430_v5, %v429_v62  ;;  %401 = vadd.xlane.f32.xlu1 %v400_v63  ;;  %v272_v63 = vlaneseq }
 0x16d   : > { %432 = vadd.xlane.f32.xlu2 %v431_v12  ;;  %v1784_v4 = vshrl.u32 %v272_v63, 7  ;;  %v278_v5 = vand.u32 127, %v272_v63 }
 0x16f   : > { %v276_v6 = vadd.s32 24, %v1784_v4  ;;  %v279_v9 = vmul.u32 2, %v278_v5  ;;  %v275_v12 = vadd.s32 16, %v1784_v4  ;;  %v274_v15 = vadd.s32 8, %v1784_v4 }
 0x171   : > { %vm283_vm13 = vcmp.eq.s32.totalorder %v276_v6, %v279_v9  ;;  %vm282_vm14 = vcmp.eq.s32.totalorder %v275_v12, %v279_v9  ;;  %vm281_vm15 = vcmp.eq.s32.totalorder %v274_v15, %v279_v9  ;;  %vm280_vm1 = vcmp.eq.s32.totalorder %v1784_v4, %v279_v9 }
 0x172   : > { %1192 = vmatpush.msk.msra.mxu0 %vm283_vm13, %v1474_v13  ;;  %1210 = vmatpush.msk.msra.mxu3 %vm283_vm13, %v1474_v13  ;;  %vm1026_vm13 = vcmp.eq.s32.totalorder %v1784_v4, 0 }
 0x173   : > { %1198 = vmatpush.msk.msra.mxu1 %vm281_vm15, %v1474_v13  ;;  %1201 = vmatpush.msk.msra.mxu2 %vm280_vm1, %v1474_v13 }
 0x174   : > { %1193 = vmatpush.msk.msra.mxu0 %vm282_vm14, %v1474_v13  ;;  %1211 = vmatpush.msk.msra.mxu3 %vm282_vm14, %v1474_v13  ;;  %vm1033_vm14 = vcmp.eq.s32.totalorder %v1784_v4, 2 }
 0x175   : > { %462 = vadd.xlane.f32.xlu2 %v461_v16  ;;  %1199 = vmatpush.msk.msra.mxu1 %vm280_vm1, %v1474_v13 }
 0x176   : > { %1194 = vmatpush.msk.msra.mxu0 %vm281_vm15, %v1474_v13  ;;  %1212 = vmatpush.msk.msra.mxu3 %vm281_vm15, %v1474_v13  ;;  %vm1037_vm15 = vcmp.eq.s32.totalorder %v1784_v4, 3 }
 0x178   : > { %1195 = vmatpush.msk.msra.mxu0 %vm280_vm1, %v1474_v13  ;;  %1213 = vmatpush.msk.msra.mxu3 %vm280_vm1, %v1474_v13 }
 0x1de   : > { %v402_v17 = vpop.xlane.xlu1 %401 }
 0x1df   : > { %v403_v21 = vrot.slane %v402_v17, 4 }
 0x1e0   : > { %v433_v22 = vpop.xlane.xlu2 %432 }
 0x1e1   : > { %v434_v23 = vrot.slane %v433_v22, 4  ;;  %v404_v24 = vadd.f32 %v403_v21, %v402_v17 }
 0x1e3   : > { %v435_v25 = vadd.f32 %v434_v23, %v433_v22  ;;  %v405_v26 = vrot.slane %v404_v24, 2 }
 0x1e5   : > { %v436_v27 = vrot.slane %v435_v25, 2  ;;  %v406_v28 = vadd.f32 %v405_v26, %v404_v24 }
 0x1e7   : > { %v407_v29 = vrot.slane %v406_v28, 1  ;;  %v437_v34 = vadd.f32 %v436_v27, %v435_v25 }
 0x1e8   : > { %v463_v35 = vpop.xlane.xlu2 %462 }
 0x1e9   : > { %v464_v36 = vrot.slane %v463_v35, 4  ;;  %v408_v37 = vadd.f32 %v407_v29, %v406_v28  ;;  %v438_v38 = vrot.slane %v437_v34, 1 }
 0x1eb   : > { %v465_v14 = vadd.f32 %v464_v36, %v463_v35  ;;  %1222 = vpush %v408_v37  ;;  %v439_v40 = vadd.f32 %v438_v38, %v437_v34 }
 0x1ed   : > { %v466_v41 = vrot.slane %v465_v14, 2  ;;  %1224 = vpush %v439_v40 }
 0x1ef   : > { %v467_v42 = vadd.f32 %v466_v41, %v465_v14 }
 0x1f1   : > { %v468_v43 = vrot.slane %v467_v42, 1 }
 0x1f3   : > { %v469_v7 = vadd.f32 %v468_v43, %v467_v42 }
 0x1f5   : > { %1226 = vpush %v469_v7 }
 0x21c   : > { %s1223_s7 = spop %1222 }
 0x21d   : > { %s410_s10 = smul.f32 %s1223_s7, %s1720_s20 }
 0x21e   : > { %s1225_s11 = spop %1224 }
 0x21f   : > { %s411_s19 = sadd.f32 1e-06, %s410_s10  ;;  %s441_s30 = smul.f32 %s1225_s11, %s1720_s20 }
 0x221   : > { %v471_v8 = vstv %s411_s19  ;;  %s442_s4 = sadd.f32 1e-06, %s441_s30  ;;  %s1053_s19 = scalar_lea.hbm %s1998_s3, %s1204_s29 }
 0x222   : > { %1306 = vrcp.f32 %v471_v8  ;;  %v483_v48 = vand.u32 2147483648, %v471_v8  ;;  %v481_v51 = vand.u32 2147483647, %v471_v8  ;;  %vm477_vm6 = vweird.f32 %v471_v8 }
 0x223   : > { %v492_v10 = vstv %s442_s4 }
 0x224   : > { %1308 = vrcp.f32 %v492_v10  ;;  %v504_v52 = vand.u32 2147483648, %v492_v10  ;;  %v502_v55 = vand.u32 2147483647, %v492_v10  ;;  %v484_v56 = vor.u32 1.1754944e-38, %v483_v48 }
 0x225   : > { %vm482_vm9 = vcmp.eq.f32.partialorder %v481_v51, 8.507059e+37  ;;  %vm498_vm10 = vweird.f32 %v492_v10 }
 0x226   : > { %v505_v60 = vor.u32 1.1754944e-38, %v504_v52  ;;  %vm503_vm12 = vcmp.eq.f32.partialorder %v502_v55, 8.507059e+37  ;;  %s1790_s21 = spop %1226 }
 0x228   : > { %v1307_v11 = vpop.eup %1306 }
 0x229   : > { %v473_v44 = vmul.f32 %v1307_v11, %v471_v8  ;;  %vm478_vm5 = vweird.f32 %v1307_v11 }
 0x22a   : > { %v1309_v45 = vpop.eup %1308  ;;  %vm479_vm8 = vmor %vm477_vm6, %vm478_vm5  ;;  %vm869_vm5 = vcmask 130048   ;;  %vm716_vm6 = vcmask 244736  }
 0x22b   : > { %v474_v46 = vsub.f32 1.0, %v473_v44  ;;  %v494_v47 = vmul.f32 %v1309_v45, %v492_v10  ;;  %vm499_vm7 = vweird.f32 %v1309_v45 }
 0x22c   : > { %vm500_vm11 = vmor %vm498_vm10, %vm499_vm7  ;;  %vm722_vm7 = vcmask 242688   ;;  %vm936_vm10 = vcmask 46080  }
 0x22d   : > { %v495_v49 = vsub.f32 1.0, %v494_v47  ;;  %v475_v50 = vmul.f32 %v1307_v11, %v474_v46 }
 0x22f   : > { %v476_v53 = vadd.f32 %v1307_v11, %v475_v50  ;;  %v496_v54 = vmul.f32 %v1309_v45, %v495_v49 }
 0x231   : > { %v480_v57 = vsel %vm479_vm8, %v1307_v11, %v476_v53  ;;  %v497_v58 = vadd.f32 %v1309_v45, %v496_v54  ;;  %vm856_vm8 = vcmask 111616  }
 0x232   : > { %v485_v59 = vsel %vm482_vm9, %v484_v56, %v480_v57  ;;  %vm854_vm9 = vcmask 113664  }
 0x233   : > { %1228 = vpush %v485_v59  ;;  %v501_v61 = vsel %vm500_vm11, %v1309_v45, %v497_v58  ;;  %vm1014_vm11 = vcmask 9216  }
 0x234   : > { %v506_v62 = vsel %vm503_vm12, %v505_v60, %v501_v61  ;;  %vm1029_vm12 = vcmp.eq.s32.totalorder %v1784_v4, 1 }
 0x235   : > { %1230 = vpush %v506_v62 }
 0x264   : > { %s1229_s26 = spop %1228 }
 0x265   : > { %v487_v16 = vstv %s1229_s26  ;;  %s1043_s26 = scalar_lea.sflag [#allocation7], %s1641_s0 }
 0x266   : > { %v488_v17 = vmul.f32 %v487_v16, %v1730_v30  ;;  %v489_v21 = vmul.f32 %v487_v16, %v1733_v31  ;;  %v490_v22 = vmul.f32 %v487_v16, %v1736_v32  ;;  %v491_v23 = vmul.f32 %v487_v16, %v1739_v33  ;;  %s1231_s27 = spop %1230 }
 0x267   : > { %v508_v24 = vstv %s1231_s27 }
 0x268   : > { %v509_v25 = vmul.f32 %v508_v24, %v1747_v18  ;;  %v510_v26 = vmul.f32 %v508_v24, %v1750_v19  ;;  %v511_v27 = vmul.f32 %v508_v24, %v1753_v20  ;;  %v512_v28 = vmul.f32 %v508_v24, %v1756_v39 }
 0x26a   : > { %v513_v29 = vsub.f32 %v488_v17, %v509_v25  ;;  %v514_v34 = vsub.f32 %v489_v21, %v510_v26  ;;  %v515_v35 = vsub.f32 %v490_v22, %v511_v27  ;;  %v516_v30 = vsub.f32 %v491_v23, %v512_v28 }
 0x26c   : > { %v517_v31 = vmul.f32 %v513_v29, %v1654_v0  ;;  %v518_v32 = vmul.f32 %v514_v34, %v1656_v1  ;;  %v519_v33 = vmul.f32 %v515_v35, %v1658_v2  ;;  %v1804_v36 = vmul.f32 %v516_v30, %v1660_v3 }
 0x26e   : > { %734 = vst.msk [vmem:[#allocation2] sm:$0xff] %vm304_vm0, %v517_v31  ;;  %v586_v18 = vrot.slane %v517_v31, 6  ;;  %v587_v19 = vrot.slane %v518_v32, 6  ;;  %v589_v20 = vrot.slane %v519_v33, 6  ;;  %v591_v39 = vrot.slane %v1804_v36, 6 }
 0x26f   : > { %735 = vst.msk [vmem:[#allocation2 + $0x8] sm:$0xff] %vm304_vm0, %v518_v32  ;;  %v541_v37 = vmul.f32 2.0, %v517_v31  ;;  %v542_v0 = vmul.f32 2.0, %v518_v32  ;;  %v570_v38 = vrot.slane %v517_v31, 2  ;;  %v571_v1 = vrot.slane %v518_v32, 2 }
 0x270   : > { %736 = vst.msk [vmem:[#allocation2 + $0x10] sm:$0xff] %vm304_vm0, %v519_v33  ;;  %v597_v2 = vsub.f32 %v517_v31, %v586_v18  ;;  %v590_v3 = vsel %vm585_vm2, %v587_v19, %v589_v20  ;;  %v588_v14 = vsel %vm585_vm2, %v586_v18, %v587_v19  ;;  %v1821_v8 = vmul.f32 2.0, %v1804_v36 }
 0x271   : > { %737 = vst.msk [vmem:[#allocation2 + $0x18] sm:$0xff] %vm304_vm0, %v1804_v36  ;;  %v1814_v40 = vsub.f32 %v519_v33, %v590_v3  ;;  %v1816_v41 = vsub.f32 %v518_v32, %v588_v14  ;;  %v550_v42 = vrot.slane %v541_v37, 1  ;;  %v551_v43 = vrot.slane %v542_v0, 1 }
 0x272   : > { %649 = vrot.lane.b32.xlu2 %v597_v2, %s1475_s28  ;;  %v572_v7 = vsel %vm569_vm3, %v570_v38, %v571_v1  ;;  %v592_v10 = vsel %vm585_vm2, %v589_v20, %v591_v39  ;;  %v575_v11 = vrot.slane %v1804_v36, 2  ;;  %v555_v45 = vrot.slane %v1821_v8, 1 }
 0x273   : > { %653 = vrot.lane.b32.xlu0 %v1814_v40, %s1475_s28  ;;  %651 = vrot.lane.b32.xlu1 %v1816_v41, %s1475_s28  ;;  %v552_v44 = vsel %vm549_vm4, %v550_v42, %v551_v43  ;;  %v543_v46 = vmul.f32 2.0, %v519_v33  ;;  %v573_v47 = vrot.slane %v519_v33, 2  ;;  %v521_v49 = vand.u32 2147483647, %v517_v31 }
 0x274   : > { %v561_v48 = vadd.f32 %v552_v44, %v517_v31  ;;  %v522_v50 = vand.u32 2147483647, %v518_v32  ;;  %v523_v51 = vand.u32 2147483647, %v519_v33  ;;  %v1832_v53 = vsub.f32 %v1804_v36, %v592_v10 }
 0x275   : > { %v553_v54 = vrot.slane %v543_v46, 1  ;;  %v576_v55 = vsel %vm569_vm3, %v573_v47, %v575_v11  ;;  %v574_v56 = vsel %vm569_vm3, %v571_v1, %v573_v47  ;;  %v524_v58 = vand.u32 2147483647, %v1804_v36 }
 0x276   : > { %v738_v52 = vld [vmem:[#allocation2] ss:$2 sm:$0xff]  ;;  %v1839_v57 = vadd.f32 %v572_v7, %v561_v48  ;;  %v525_v59 = vsel %vm304_vm0, %v521_v49, 0.0  ;;  %v526_v60 = vsel %vm304_vm0, %v522_v50, 0.0  ;;  %v621_v62 = vmul.f32 2.0, %v597_v2 }
 0x277   : > { %1196 = vmatmul.msk.f32.vlgmr.msra.gmra.mxu0 %vm304_vm0, %v738_v52  ;;  %v556_v63 = vsel %vm549_vm4, %v553_v54, %v555_v45  ;;  %v554_v5 = vsel %vm549_vm4, %v551_v43, %v553_v54  ;;  %v527_v6 = vadd.f32 %v526_v60, %v525_v59  ;;  %v622_v9 = vmul.f32 2.0, %v1816_v41 }
 0x278   : > { %v740_v61 = vld [vmem:[#allocation2 + $0x10] ss:$2 sm:$0xff]  ;;  %v563_v12 = vadd.f32 %v556_v63, %v519_v33  ;;  %v562_v13 = vadd.f32 %v554_v5, %v518_v32  ;;  %v528_v15 = vsel %vm304_vm0, %v523_v51, 0.0  ;;  %v530_v22 = vsel %vm304_vm0, %v524_v58, 0.0 }
 0x279   : > { %1197 = vmatmul.msk.f32.vlgmr.msra.gmra.mxu3 %vm304_vm0, %v740_v61  ;;  %v529_v16 = vadd.f32 %v528_v15, %v527_v6  ;;  %v623_v24 = vmul.f32 2.0, %v1814_v40  ;;  %v624_v25 = vmul.f32 2.0, %v1832_v53  ;;  %vm948_vm0 = vcmask 64512  }
 0x27a   : > { %655 = vrot.lane.b32.xlu2 %v1832_v53, %s1475_s28  ;;  %v1855_v17 = vadd.f32 %v576_v55, %v563_v12  ;;  %v1857_v21 = vadd.f32 %v574_v56, %v562_v13  ;;  %v564_v52 = vadd.f32 %v555_v45, %v1804_v36 }
 0x27b   : > { %629 = vrot.lane.b32.xlu0 %v621_v62, %s1476_s9  ;;  %631 = vrot.lane.b32.xlu1 %v622_v9, %s1476_s9  ;;  %v1860_v23 = vadd.f32 %v530_v22, %v529_v16 }
 0x27c   : > { %v1901_v54 = vadd.f32 %v575_v11, %v564_v52 }
 0x282   : > { %633 = vrot.lane.b32.xlu2 %v623_v24, %s1476_s9 }
 0x283   : > { %635 = vrot.lane.b32.xlu0 %v624_v25, %s1476_s9 }
 0x2cc   : > { %v650_v29 = vpop.permute.xlu2 %649 }
 0x2d4   : > { %v656_v58 = vpop.permute.xlu2 %655 }
 0x2dc   : > { %v634_v13 = vpop.permute.xlu2 %633 }
 0x2dd   : > { %v643_v16 = vadd.f32 %v634_v13, %v1814_v40 }
 0x2e5   : > { %v1866_v26 = vpop.permute.xlu0 %653  ;;  %v652_v63 = vpop.permute.xlu1 %651 }
 0x2e6   : > { %v663_v24 = vadd.f32 %v1866_v26, %v643_v16 }
 0x2ed   : > { %v630_v27 = vpop.permute.xlu0 %629  ;;  %v632_v5 = vpop.permute.xlu1 %631 }
 0x2ee   : > { %v641_v28 = vadd.f32 %v630_v27, %v597_v2  ;;  %v642_v12 = vadd.f32 %v632_v5, %v1816_v41 }
 0x2f0   : > { %v1868_v34 = vadd.f32 %v650_v29, %v641_v28  ;;  %v662_v22 = vadd.f32 %v652_v63, %v642_v12  ;;  %v671_v28 = vand.u32 2147483647, %v663_v24 }
 0x2f2   : > { %v670_v25 = vand.u32 2147483647, %v662_v22  ;;  %v669_v29 = vand.u32 2147483647, %v1868_v34 }
 0x2f4   : > { %v764_v35 = vpop.f32.mrf.mxu0  ;;  %v678_v41 = vrot.slane %v670_v25, 2 }
 0x2f5   : > { %v790_v30 = vrot.slane %v764_v35, 6  ;;  %870 = vst.msk [vmem:[#allocation3] sm:$0xff] %vm869_vm5, %v764_v35  ;;  %v770_v33 = vmul.f32 2.0, %v764_v35  ;;  %v783_v19 = vrot.slane %v764_v35, 2  ;;  %v636_v55 = vpop.permute.xlu0 %635 }
 0x2f6   : > { %v644_v56 = vadd.f32 %v636_v55, %v1832_v53 }
 0x2f7   : > { %v1871_v31 = vsub.f32 %v764_v35, %v790_v30  ;;  %v774_v0 = vrot.slane %v770_v33, 1 }
 0x2f8   : > { %v664_v59 = vadd.f32 %v656_v58, %v644_v56 }
 0x2f9   : > { %821 = vrot.lane.b32.xlu2 %v1871_v31, %s1475_s28  ;;  %v807_v32 = vmul.f32 2.0, %v1871_v31 }
 0x2fa   : > { %v672_v60 = vand.u32 2147483647, %v664_v59 }
 0x2fb   : > { %811 = vrot.lane.b32.xlu1 %v807_v32, %s1476_s9 }
 0x2fc   : > { %v767_v18 = vpop.f32.mrf.mxu3  ;;  %v682_v62 = vrot.slane %v672_v60, 2 }
 0x2fd   : > { %v771_v20 = vmul.f32 2.0, %v767_v18  ;;  %v784_v39 = vrot.slane %v767_v18, 2  ;;  %v791_v37 = vrot.slane %v767_v18, 6  ;;  %871 = vst.msk [vmem:[#allocation3 + $0x8] sm:$0xff] %vm869_vm5, %v767_v18 }
 0x2ff   : > { %v775_v38 = vrot.slane %v771_v20, 1  ;;  %v792_v1 = vsel %vm585_vm2, %v790_v30, %v791_v37  ;;  %v785_v2 = vsel %vm569_vm3, %v783_v19, %v784_v39  ;;  %v677_v30 = vrot.slane %v669_v29, 2 }
 0x300   : > { %v1880_v3 = vsub.f32 %v767_v18, %v792_v1 }
 0x301   : > { %v776_v14 = vsel %vm549_vm4, %v774_v0, %v775_v38  ;;  %v780_v42 = vadd.f32 %v775_v38, %v767_v18  ;;  %v679_v33 = vsel %vm569_vm3, %v677_v30, %v678_v41 }
 0x302   : > { %v808_v43 = vmul.f32 2.0, %v1880_v3  ;;  %v779_v7 = vadd.f32 %v776_v14, %v764_v35  ;;  %v680_v35 = vrot.slane %v671_v28, 2 }
 0x303   : > { %823 = vrot.lane.b32.xlu1 %v1880_v3, %s1475_s28  ;;  %v1886_v10 = vadd.f32 %v784_v39, %v780_v42 }
 0x304   : > { %813 = vrot.lane.b32.xlu0 %v808_v43, %s1476_s9  ;;  %v872_v44 = vld [vmem:[#allocation3] ss:$2 sm:$0xff]  ;;  %v1889_v46 = vadd.f32 %v785_v2, %v779_v7  ;;  %v681_v40 = vsel %vm569_vm3, %v678_v41, %v680_v35  ;;  %v683_v0 = vsel %vm569_vm3, %v680_v35, %v682_v62 }
 0x305   : > { %1200 = vmatmul.msk.f32.vlgmr.msra.gmra.mxu1 %vm869_vm5, %v872_v44 }
 0x353   : > { %v822_v19 = vpop.permute.xlu2 %821 }
 0x36d   : > { %v812_v27 = vpop.permute.xlu1 %811 }
 0x36e   : > { %v817_v34 = vadd.f32 %v812_v27, %v1871_v31 }
 0x370   : > { %v827_v39 = vadd.f32 %v822_v19, %v817_v34 }
 0x372   : > { %v831_v2 = vand.u32 2147483647, %v827_v39 }
 0x374   : > { %v835_v7 = vrot.slane %v831_v2, 2 }
 0x375   : > { %v824_v18 = vpop.permute.xlu1 %823 }
 0x376   : > { %v814_v32 = vpop.permute.xlu0 %813 }
 0x377   : > { %v818_v26 = vadd.f32 %v814_v32, %v1880_v3 }
 0x379   : > { %v828_v20 = vadd.f32 %v824_v18, %v818_v26 }
 0x37b   : > { %v832_v38 = vand.u32 2147483647, %v828_v20 }
 0x37d   : > { %v836_v14 = vrot.slane %v832_v38, 2 }
 0x37f   : > { %v837_v44 = vsel %vm569_vm3, %v835_v7, %v836_v14 }
 0x382   : > { %v893_v47 = vpop.f32.mrf.mxu1 }
 0x383   : > { %v905_v48 = vrot.slane %v893_v47, 6  ;;  %949 = vst.msk [vmem:[#allocation4] sm:$0xff] %vm948_vm0, %v893_v47  ;;  %v896_v61 = vmul.f32 2.0, %v893_v47  ;;  %v902_v11 = vrot.slane %v893_v47, 2 }
 0x385   : > { %v907_v49 = vsub.f32 %v893_v47, %v905_v48  ;;  %v898_v8 = vrot.slane %v896_v61, 1 }
 0x387   : > { %920 = vrot.lane.b32.xlu2 %v907_v49, %s1475_s28  ;;  %v913_v50 = vmul.f32 2.0, %v907_v49  ;;  %v900_v36 = vadd.f32 %v898_v8, %v893_v47 }
 0x389   : > { %915 = vrot.lane.b32.xlu0 %v913_v50, %s1476_s9  ;;  %v1909_v45 = vadd.f32 %v902_v11, %v900_v36 }
 0x38a   : > { %v950_v51 = vld [vmem:[#allocation4] ss:$2 sm:$0xf] }
 0x38b   : > { %1202 = vmatmul.msk.f32.vlgmr.msra.gmra.mxu2 %vm948_vm0, %v950_v51 }
 0x38f   : > { %605 = vrot.lane.b32.xlu2 %v1839_v57, %s1477_s5 }
 0x397   : > { %611 = vrot.lane.b32.xlu2 %v1901_v54, %s1477_s5 }
 0x39f   : > { %799 = vrot.lane.b32.xlu2 %v1889_v46, %s1477_s5 }
 0x3a7   : > { %690 = vrot.lane.b32.xlu2 %v682_v62, %s1477_s5 }
 0x3af   : > { %909 = vrot.lane.b32.xlu2 %v1909_v45, %s1477_s5 }
 0x3e1   : > { %v921_v42 = vpop.permute.xlu2 %920 }
 0x3e9   : > { %v606_v52 = vpop.permute.xlu2 %605 }
 0x3f1   : > { %v612_v56 = vpop.permute.xlu2 %611 }
 0x3f2   : > { %v620_v22 = vsub.f32 %v1901_v54, %v612_v56 }
 0x3f4   : > { %v668_v27 = vand.u32 2147483647, %v620_v22 }
 0x3f9   : > { %v800_v63 = vpop.permute.xlu2 %799 }
 0x3fb   : > { %v916_v37 = vpop.permute.xlu0 %915 }
 0x3fc   : > { %v918_v1 = vadd.f32 %v916_v37, %v907_v49 }
 0x3fe   : > { %v923_v43 = vadd.f32 %v921_v42, %v918_v1 }
 0x400   : > { %v925_v47 = vand.u32 2147483647, %v923_v43 }
 0x402   : > { %v927_v50 = vrot.slane %v925_v47, 2 }
 0x40e   : > { %v971_v53 = vpop.f32.mrf.mxu2 }
 0x40f   : > { %v983_v6 = vrot.slane %v971_v53, 6  ;;  %v974_v3 = vmul.f32 2.0, %v971_v53  ;;  %v980_v49 = vrot.slane %v971_v53, 2 }
 0x411   : > { %v985_v9 = vsub.f32 %v971_v53, %v983_v6  ;;  %v976_v31 = vrot.slane %v974_v3, 1 }
 0x413   : > { %998 = vrot.lane.b32.xlu0 %v985_v9, %s1475_s28  ;;  %v991_v15 = vmul.f32 2.0, %v985_v9  ;;  %v978_v48 = vadd.f32 %v976_v31, %v971_v53  ;;  %v617_v53 = vsub.f32 %v1839_v57, %v606_v52 }
 0x415   : > { %993 = vrot.lane.b32.xlu1 %v991_v15, %s1476_s9  ;;  %v982_v51 = vadd.f32 %v980_v49, %v978_v48  ;;  %v665_v12 = vand.u32 2147483647, %v617_v53 }
 0x41b   : > { %609 = vrot.lane.b32.xlu0 %v1855_v17, %s1477_s5 }
 0x41d   : > { %607 = vrot.lane.b32.xlu1 %v1857_v21, %s1477_s5 }
 0x423   : > { %686 = vrot.lane.b32.xlu0 %v681_v40, %s1477_s5 }
 0x425   : > { %684 = vrot.lane.b32.xlu1 %v679_v33, %s1477_s5 }
 0x42b   : > { %688 = vrot.lane.b32.xlu0 %v683_v0, %s1477_s5 }
 0x42d   : > { %801 = vrot.lane.b32.xlu1 %v1886_v10, %s1477_s5 }
 0x433   : > { %840 = vrot.lane.b32.xlu0 %v836_v14, %s1477_s5 }
 0x435   : > { %838 = vrot.lane.b32.xlu1 %v837_v44, %s1477_s5 }
 0x43b   : > { %928 = vrot.lane.b32.xlu0 %v927_v50, %s1477_s5 }
 0x43d   : > { %987 = vrot.lane.b32.xlu1 %v982_v51, %s1477_s5 }
 0x485   : > { %v999_v55 = vpop.permute.xlu0 %998 }
 0x487   : > { %v994_v58 = vpop.permute.xlu1 %993 }
 0x488   : > { %v996_v59 = vadd.f32 %v994_v58, %v985_v9 }
 0x48a   : > { %v1001_v60 = vadd.f32 %v999_v55, %v996_v59 }
 0x48c   : > { %v1003_v61 = vand.u32 2147483647, %v1001_v60 }
 0x48d   : > { %v610_v62 = vpop.permute.xlu0 %609 }
 0x48e   : > { %v1005_v8 = vrot.slane %v1003_v61, 2  ;;  %v619_v16 = vsub.f32 %v1855_v17, %v610_v62  ;;  %v805_v17 = vsub.f32 %v1889_v46, %v800_v63 }
 0x48f   : > { %v608_v36 = vpop.permute.xlu1 %607 }
 0x490   : > { %v618_v11 = vsub.f32 %v1857_v21, %v608_v36  ;;  %1006 = vrot.lane.b32.xlu2 %v1005_v8, %s1477_s5  ;;  %v691_v21 = vpop.permute.xlu2 %690  ;;  %v667_v24 = vand.u32 2147483647, %v619_v16  ;;  %v829_v32 = vand.u32 2147483647, %v805_v17 }
 0x491   : > { %v699_v29 = vadd.f32 %v691_v21, %v668_v27 }
 0x492   : > { %v666_v5 = vand.u32 2147483647, %v618_v11 }
 0x495   : > { %v687_v6 = vpop.permute.xlu0 %686 }
 0x496   : > { %v697_v13 = vadd.f32 %v687_v6, %v666_v5 }
 0x497   : > { %v685_v15 = vpop.permute.xlu1 %684 }
 0x498   : > { %v696_v9 = vadd.f32 %v685_v15, %v665_v12  ;;  %706 = vrot.lane.b32.xlu0 %v697_v13, %s1475_s28  ;;  %v910_v30 = vpop.permute.xlu2 %909 }
 0x499   : > { %v912_v33 = vsub.f32 %v1909_v45, %v910_v30 }
 0x49a   : > { %704 = vrot.lane.b32.xlu1 %v696_v9, %s1475_s28 }
 0x49d   : > { %v689_v25 = vpop.permute.xlu0 %688 }
 0x49e   : > { %v698_v28 = vadd.f32 %v689_v25, %v667_v24 }
 0x49f   : > { %v802_v57 = vpop.permute.xlu1 %801 }
 0x4a0   : > { %v806_v41 = vsub.f32 %v1886_v10, %v802_v57  ;;  %708 = vrot.lane.b32.xlu2 %v698_v28, %s1475_s28  ;;  %v924_v10 = vand.u32 2147483647, %v912_v33 }
 0x4a2   : > { %710 = vrot.lane.b32.xlu1 %v699_v29, %s1475_s28  ;;  %v830_v35 = vand.u32 2147483647, %v806_v41 }
 0x4a5   : > { %v841_v54 = vpop.permute.xlu0 %840 }
 0x4a6   : > { %v845_v40 = vadd.f32 %v841_v54, %v830_v35 }
 0x4a7   : > { %v839_v26 = vpop.permute.xlu1 %838 }
 0x4a8   : > { %v844_v18 = vadd.f32 %v839_v26, %v829_v32  ;;  %850 = vrot.lane.b32.xlu2 %v845_v40, %s1475_s28 }
 0x4aa   : > { %848 = vrot.lane.b32.xlu0 %v844_v18, %s1475_s28 }
 0x4ad   : > { %v929_v34 = vpop.permute.xlu0 %928 }
 0x4ae   : > { %v931_v19 = vadd.f32 %v929_v34, %v924_v10  ;;  %v1030_v10 = vstv %s1790_s21  ;;  %v1027_v34 = vstv %s1710_s22  ;;  %s1055_s22 = sshll.u32 %s271_s16, 4  ;;  %s1057_s21 = sshll.u32 %s1053_s19, 4  ;;  %s1056_s22 = int_to_ptr.vmem [resolvable:$true] %s1055_s22  ;;  %s1058_s21 = int_to_ptr.hbm [resolvable:$true] %s1057_s21 }
 0x4af   : > { %v988_v46 = vpop.permute.xlu1 %987  ;;  %s1414_s27 = sshra.s32 %s1058_s21, 4  ;;  %s1415_s27 = int_to_ptr.hbm [resolvable:$true] %s1414_s27 }
 0x4b0   : > { %933 = vrot.lane.b32.xlu1 %v931_v19, %s1475_s28  ;;  %v990_v20 = vsub.f32 %v982_v51, %v988_v46  ;;  %v1031_v46 = vsel %vm1029_vm12, %v1030_v10, 0.0  ;;  %p1421_p4 = scmp.lt.s32.totalorder %s1415_s27, %s1998_s3 }
 0x4b2   : > { %v1002_v39 = vand.u32 2147483647, %v990_v20  ;;  %v1028_v20 = vsel %vm1026_vm13, %v1027_v34, 0.0 }
 0x4d1   : > { %532 = vadd.xlane.f32.xlu2 %v1860_v23 }
 0x4ea   : > { %v1007_v37 = vpop.permute.xlu2 %1006 }
 0x4eb   : > { %v1009_v0 = vadd.f32 %v1007_v37, %v1002_v39  ;;  %v1032_v37 = vadd.f32 %v1031_v46, %v1028_v20 }
 0x4ed   : > { %1011 = vrot.lane.b32.xlu0 %v1009_v0, %s1475_s28  ;;  %s1416_s28 = scalar_lea.hbm %s1415_s27, 8 }
 0x4ee   : > { %p1417_p13 = scmp.ne.s32.totalorder %s1415_s27, %s1416_s28 }
 0x4f0   : > { %p1418_p2 = pnand %p1417_p13, %p1544_p11 }
 0x4f2   : > { %p1419_p3 = pneg %p1418_p2 }
 0x4fa   : > { %v709_v3 = vpop.permute.xlu2 %708 }
 0x4fb   : > { %v720_v42 = vsel %vm716_vm6, %v709_v3, 0.0 }
 0x502   : > { %v851_v44 = vpop.permute.xlu2 %850 }
 0x503   : > { %v857_v48 = vsel %vm856_vm8, %v851_v44, 0.0 }
 0x50a   : > { %v707_v45 = vpop.permute.xlu0 %706 }
 0x50b   : > { %v718_v2 = vsel %vm716_vm6, %v707_v45, 0.0 }
 0x50c   : > { %v705_v38 = vpop.permute.xlu1 %704 }
 0x50d   : > { %v717_v1 = vsel %vm716_vm6, %v705_v38, 0.0 }
 0x50e   : > { %v719_v14 = vadd.f32 %v718_v2, %v717_v1 }
 0x510   : > { %v721_v7 = vadd.f32 %v720_v42, %v719_v14 }
 0x514   : > { %v711_v43 = vpop.permute.xlu1 %710 }
 0x515   : > { %v723_v31 = vsel %vm722_vm7, %v711_v43, 0.0 }
 0x516   : > { %v724_v23 = vadd.f32 %v723_v31, %v721_v7 }
 0x518   : > { %725 = vadd.xlane.f32.xlu1 %v724_v23 }
 0x51c   : > { %v849_v47 = vpop.permute.xlu0 %848 }
 0x51d   : > { %v855_v50 = vsel %vm854_vm9, %v849_v47, 0.0 }
 0x51e   : > { %v858_v49 = vadd.f32 %v857_v48, %v855_v50 }
 0x520   : > { %859 = vadd.xlane.f32.xlu0 %v858_v49 }
 0x522   : > { %v934_v51 = vpop.permute.xlu1 %933 }
 0x523   : > { %v937_v52 = vsel %vm936_vm10, %v934_v51, 0.0 }
 0x524   : > { %938 = vadd.xlane.f32.xlu2 %v937_v52 }
 0x544   : > { %v533_v55 = vpop.xlane.xlu2 %532 }
 0x545   : > { %v534_v56 = vrot.slane %v533_v55, 4 }
 0x547   : > { %v535_v58 = vadd.f32 %v534_v56, %v533_v55 }
 0x549   : > { %v536_v59 = vrot.slane %v535_v58, 2 }
 0x54b   : > { %v537_v60 = vadd.f32 %v536_v59, %v535_v58 }
 0x54d   : > { %v538_v61 = vrot.slane %v537_v60, 1 }
 0x54f   : > { %v539_v62 = vadd.f32 %v538_v61, %v537_v60 }
 0x551   : > { %1232 = vpush %v539_v62 }
 0x55f   : > { %v1012_v8 = vpop.permute.xlu0 %1011 }
 0x560   : > { %v1015_v36 = vsel %vm1014_vm11, %v1012_v8, 0.0 }
 0x561   : > { %1016 = vadd.xlane.f32.xlu1 %v1015_v36 }
 0x582   : > { %s1233_s17 = spop %1232 }
 0x583   : > { %v1034_v19 = vstv %s1233_s17  ;;  %s1420_s17 = scalar_lea.hbm %s1998_s3, 16 }
 0x584   : > { %v1035_v39 = vsel %vm1033_vm14, %v1034_v19, 0.0  ;;  %p1422_p5 = scmp.lt.s32.totalorder %s1420_s17, %s1416_s28 }
 0x585   : > { %v1036_v0 = vadd.f32 %v1035_v39, %v1032_v37 }
 0x586   : > { %p1423_p7 = por %p1422_p5, %p1421_p4 }
 0x588   : > { %p1424_p0 = pnand %p1423_p7, %p1419_p3 }
 0x58b   : > { %v726_v11 = vpop.xlane.xlu1 %725 }
 0x58c   : > { %v727_v63 = vrot.slane %v726_v11, 4 }
 0x58e   : > { %v728_v53 = vadd.f32 %v727_v63, %v726_v11 }
 0x590   : > { %v729_v5 = vrot.slane %v728_v53, 2 }
 0x592   : > { %v730_v6 = vadd.f32 %v729_v5, %v728_v53 }
 0x593   : > { %v860_v12 = vpop.xlane.xlu0 %859 }
 0x594   : > { %v861_v13 = vrot.slane %v860_v12, 4  ;;  %v731_v15 = vrot.slane %v730_v6, 1 }
 0x596   : > { %v862_v16 = vadd.f32 %v861_v13, %v860_v12  ;;  %v732_v9 = vadd.f32 %v731_v15, %v730_v6 }
 0x597   : > { %v939_v22 = vpop.xlane.xlu2 %938 }
 0x598   : > { %v863_v21 = vrot.slane %v862_v16, 2  ;;  %v940_v24 = vrot.slane %v939_v22, 4  ;;  %1234 = vpush %v732_v9 }
 0x59a   : > { %v864_v25 = vadd.f32 %v863_v21, %v862_v16  ;;  %v941_v27 = vadd.f32 %v940_v24, %v939_v22 }
 0x59c   : > { %v942_v28 = vrot.slane %v941_v27, 2  ;;  %v865_v57 = vrot.slane %v864_v25, 1 }
 0x59e   : > { %v943_v29 = vadd.f32 %v942_v28, %v941_v27  ;;  %v866_v41 = vadd.f32 %v865_v57, %v864_v25 }
 0x5a0   : > { %1236 = vpush %v866_v41  ;;  %v944_v17 = vrot.slane %v943_v29, 1 }
 0x5a2   : > { %v945_v35 = vadd.f32 %v944_v17, %v943_v29 }
 0x5a4   : > { %1238 = vpush %v945_v35 }
 0x5c9   : > { %s1235_s25 = spop %1234 }
 0x5d1   : > { %s1237_s20 = spop %1236 }
 0x5d2   : > { %s868_s1 = sadd.f32 %s1237_s20, %s1235_s25 }
 0x5d4   : > { %v1017_v30 = vpop.xlane.xlu1 %1016 }
 0x5d5   : > { %v1018_v54 = vrot.slane %v1017_v30, 4  ;;  %s1239_s6 = spop %1238 }
 0x5d6   : > { %s947_s7 = sadd.f32 %s1239_s6, %s868_s1 }
 0x5d7   : > { %v1019_v32 = vadd.f32 %v1018_v54, %v1017_v30 }
 0x5d9   : > { %v1020_v40 = vrot.slane %v1019_v32, 2 }
 0x5db   : > { %v1021_v26 = vadd.f32 %v1020_v40, %v1019_v32 }
 0x5dd   : > { %v1022_v33 = vrot.slane %v1021_v26, 1 }
 0x5df   : > { %v1023_v18 = vadd.f32 %v1022_v33, %v1021_v26 }
 0x5e1   : > { %1240 = vpush %v1023_v18 }
 0x612   : > { %s1241_s30 = spop %1240 }
 0x613   : > { %s1025_s4 = sadd.f32 %s1241_s30, %s947_s7 }
 0x615   : > { %v1038_v45 = vstv %s1025_s4 }
 0x616   : > { %v1039_v38 = vsel %vm1037_vm15, %v1038_v45, 0.0 }
 0x617   : > { %v1040_v1 = vadd.f32 %v1039_v38, %v1036_v0 }
 0x619   : > { %1041 = vst [vmem:[%s271_s16] sm:$0xff] %v1040_v1 }
 0x61a   : > { %1427 = shalt.err (!%p1424_p0)
}
 0x61b   : > { %1248 = dma.vmem_to_hbm [thread:$0]  (%p1544_p11), %s1056_s22, 128, %s1058_s21, %s1043_s26  }
 0x61c PF: > { %s1069_s0 = sand.u32 1, %s1458_s12   ;;  %p1261_p8 = pnand %p1173_p9, %p1548_p12 }
 0x61d   : > { %s1070_s8 = scalar_lea.sflag [#allocation7], %s1069_s0 }
 0x61e   : > { %p1262_p10 = pneg %p1261_p8 }
 0x620   : > { %1453 = dma.done.wait (%p1262_p10), %s1070_s8, 128  }
 0x621   : > { %1455 = vsyncadd (%p1262_p10), %s1070_s8, 4294967168  ;;  %s2012_s6 = sld [smem:[#allocation15_spill]]  ;;  %p19_p1 = scmp.ge.s32.totalorder %s1523_s18, 4  }
 0x622   : > { %s2013_s12 = smov %s1462_s13  ;;  %s2014_s13 = smov %s1466_s14 }
 0x623   : > { %s2016_s15 = smov %s1523_s18  ;;  %21 = sbr.rel (!%p19_p1) target bundleno = 10 (0xa), region = 102 }
 0x627   : > { %s2015_s14 = smov %s2012_s6 }
 0x628   :  { %1076 = vsyncpa [#allocation6], 1 }
 0x629   :  { %1078 = vsyncpa [#allocation6 + $0x1], 1 }
 0x62a   :  { %1079 = vsyncpa [#allocation9], 1 }
 0x62b   :  { %1081 = vsyncpa [#allocation9 + $0x1], 1 }
 0x62c   :  { %1082 = vsyncpa [#allocation7], 1 }
 0x62d   :  { %1084 = vsyncpa [#allocation7 + $0x1], 1 }

</bundles_post_ra>
